<compile_context>
chip_gen: v7x
topology: tpu7x:2x2x1
jax: 0.10.0
libtpu: 0.0.40
codegen_flags: <defaults>
</compile_context>

<pallas_src>
import jax
import jax.numpy as jnp
from jax import lax
from jax.experimental import pallas as pl
from jax.experimental.pallas import tpu as pltpu


def _round_up(x, m):
    return ((x + m - 1) // m) * m


def bottleneck_kernel(x_ref, w1_ref, w2_ref, w3_ref, b3_ref,
                      s1_ref, t1_ref, t2_ref, t3_ref,
                      o_ref, pad_ref, col_ref):
    """One batch-block of images, fully resident in VMEM."""
    B, H, W, Cin = x_ref.shape
    P = w1_ref.shape[1]              # planes
    LP = w2_ref.shape[0] // 9        # lane-aligned per-tap stride in the im2col buf
    Cout = w3_ref.shape[1]           # 4 * planes (== Cin for the identity residual)
    M = B * H * W

    # --- BN1 + ReLU (eval-mode BN folded to scale/shift; f32 on the VPU).
    #     The loaded x is consumed here and NOT kept live across the body; it is
    #     re-read from VMEM for the residual add (short live range, no spills). ---
    h = x_ref[...].astype(jnp.float32).reshape(M, Cin)
    h = jnp.maximum(h * s1_ref[...] + t1_ref[...], 0.0)

    # --- conv1 (1x1): channel matmul on the MXU (bf16 operands, f32 acc).
    #     BN2 scale folded into w1; conv1 bias + BN2 shift folded into t2. ---
    h = jnp.dot(h.astype(jnp.bfloat16), w1_ref[...],
                preferred_element_type=jnp.float32)
    h = jnp.maximum(h + t2_ref[...], 0.0)

    # --- conv2 (3x3, stride 1, padding 1) as ONE im2col matmul.
    #     bf16 padded-activation scratch: only the 1-pixel border is re-zeroed each
    #     step (interior is fully overwritten), so the kernel stays safe under
    #     "parallel" (megacore-sharded) grid semantics. ---
    pad_ref[:, 0:1, :, :] = jnp.zeros((B, 1, W + 2, P), jnp.bfloat16)
    pad_ref[:, H + 1:H + 2, :, :] = jnp.zeros((B, 1, W + 2, P), jnp.bfloat16)
    pad_ref[:, :, 0:1, :] = jnp.zeros((B, H + 2, 1, P), jnp.bfloat16)
    pad_ref[:, :, W + 1:W + 2, :] = jnp.zeros((B, H + 2, 1, P), jnp.bfloat16)
    pad_ref[:, 1:H + 1, 1:W + 1, :] = h.astype(jnp.bfloat16).reshape(B, H, W, P)

    if LP != P:
        # P is not a multiple of 128: each tap occupies [tap*LP, tap*LP+P) with
        # (LP - P) unused lanes; clear them so stale VMEM (possible NaNs) never
        # reaches the matmul (matching weight rows are zero-padded at prep time).
        col_ref[...] = jnp.zeros(col_ref.shape, col_ref.dtype)
    for kh in range(3):              # static python loops -> fully unrolled
        for kw in range(3):
            tap = kh * 3 + kw        # lane-tile-aligned base offset (LP % 128 == 0)
            col_ref[:, :, :, tap * LP:tap * LP + P] = \
                pad_ref[:, kh:kh + H, kw:kw + W, :]

    # Single deep-K MXU matmul: fills the 256-deep MXU on v6e/v7x and removes the
    # 8 VPU accumulate passes of the per-tap formulation.
    h = jnp.dot(col_ref[...].reshape(M, 9 * LP), w2_ref[...],
                preferred_element_type=jnp.float32)
    h = jnp.maximum(h + t3_ref[...], 0.0)    # conv2 bias + BN3 shift (scale in w2)

    # --- conv3 (1x1) + identity residual (x re-read from VMEM) ---
    o = jnp.dot(h.astype(jnp.bfloat16), w3_ref[...],
                preferred_element_type=jnp.float32) + b3_ref[...]
    o = o + x_ref[...].astype(jnp.float32).reshape(M, Cout)
    o_ref[...] = o.reshape(B, H, W, Cout).astype(o_ref.dtype)


def prepare_params(w1_oihw, b1, w2_oihw, b2, w3_oihw, b3,
                   s1, t1, s2, t2, s3, t3):
    """Fold BN scales/biases into weights, reorder to kernel layout, cast to bf16."""
    planes = w2_oihw.shape[1]
    LP = _round_up(planes, 128)      # lane-aligned per-tap stride for im2col
    # conv1 followed by BN2:  (h @ W1 + b1) * s2 + t2 == h @ (W1*s2) + (b1*s2 + t2)
    w1_k = (jnp.transpose(w1_oihw[:, :, 0, 0], (1, 0))            # (Cin, P)
            * s2[None, :]).astype(jnp.bfloat16)
    t2_k = (b1 * s2 + t2).reshape(1, -1).astype(jnp.float32)
    # conv2 followed by BN3:  (conv(h, W2) + b2) * s3 + t3
    w2_t = (jnp.transpose(w2_oihw, (2, 3, 1, 0))                  # (3, 3, Pin, Pout)
            * s3[None, None, None, :])
    w2_pad = jnp.zeros((3, 3, LP, w2_oihw.shape[0]), jnp.float32)
    w2_pad = w2_pad.at[:, :, :planes, :].set(w2_t)                # zero-pad unused lanes
    w2_k = w2_pad.reshape(9 * LP, w2_oihw.shape[0]).astype(jnp.bfloat16)
    t3_k = (b2 * s3 + t3).reshape(1, -1).astype(jnp.float32)
    # conv3 (no BN after)
    w3_k = jnp.transpose(w3_oihw[:, :, 0, 0], (1, 0)).astype(jnp.bfloat16)  # (P, 4P)
    b3_k = b3.reshape(1, -1).astype(jnp.float32)
    s1_k = s1.reshape(1, -1).astype(jnp.float32)
    t1_k = t1.reshape(1, -1).astype(jnp.float32)
    return (w1_k, w2_k, w3_k, b3_k, s1_k, t1_k, t2_k, t3_k)


def _vmem_capacity_bytes(default=64 * 1024 * 1024):
    try:
        return int(pltpu.get_tpu_info().vmem_capacity_bytes)
    except Exception:
        return default


def _pick_batch_block(n, per_image_bytes, budget_bytes, min_grid_steps):
    """Largest divisor of n that fits the VMEM budget and keeps the grid long
    enough for pipelining / megacore sharding."""
    target_steps = min(min_grid_steps, n)
    for bb in range(n, 0, -1):
        if n % bb:
            continue
        if n // bb < target_steps:
            continue
        if bb > 1 and bb * per_image_bytes > budget_bytes:
            continue
        return bb
    return 1


def bottleneck_forward_nhwc(x_nhwc, params, *, batch_block=None, out_dtype=None,
                            min_grid_steps=8):
    """Production entry point. x_nhwc: (N, H, W, C) f32/bf16; returns (N, H, W, 4P)."""
    w1, w2, w3, b3, s1, t1, t2, t3 = params
    N, H, W, Cin = x_nhwc.shape
    P = w1.shape[1]
    LP = w2.shape[0] // 9
    Cout = w3.shape[1]
    assert Cin == Cout, "identity residual requires inplanes == 4*planes"
    if out_dtype is None:
        out_dtype = x_nhwc.dtype

    # Generation-aware VMEM budgeting (v7x: 64 MiB, v5e/v6e: 128 MiB).
    vmem_cap = _vmem_capacity_bytes()
    vmem_limit = min(vmem_cap * 3 // 4, 100 * 1024 * 1024)

    xb = jnp.dtype(x_nhwc.dtype).itemsize
    ob = jnp.dtype(out_dtype).itemsize
    per_image = (2 * H * W * Cin * xb            # double-buffered input block
                 + 2 * H * W * Cout * ob         # double-buffered output block
                 + (H + 2) * (W + 2) * P * 2     # bf16 padded-activation scratch
                 + H * W * 9 * LP * 2            # bf16 im2col scratch
                 + H * W * (Cin + 4 * P) * 4)    # rough f32 value headroom
    if batch_block is None:
        batch_block = _pick_batch_block(N, per_image, vmem_limit // 2, min_grid_steps)
    assert N % batch_block == 0
    # TODO(synk): row tiling with a 1-row halo for H*W >= ~784 so per-step VMEM is
    # bounded even when a single image no longer fits (see module docstring).

    Mt = N * H * W
    cost = pl.CostEstimate(
        flops=int(2 * Mt * (Cin * P + 9 * LP * P + P * Cout)),
        transcendentals=0,
        bytes_accessed=int(Mt * (Cin * xb + Cout * ob)
                           + 2 * (w1.size + w2.size + w3.size)
                           + 4 * (b3.size + s1.size + t1.size + t2.size + t3.size)))

    def full(a):
        nd = a.ndim
        return pl.BlockSpec(a.shape, lambda b, _nd=nd: (0,) * _nd)

    return pl.pallas_call(
        bottleneck_kernel,
        out_shape=jax.ShapeDtypeStruct((N, H, W, Cout), out_dtype),
        grid=(N // batch_block,),
        in_specs=[pl.BlockSpec((batch_block, H, W, Cin), lambda b: (b, 0, 0, 0)),
                  full(w1), full(w2), full(w3), full(b3),
                  full(s1), full(t1), full(t2), full(t3)],
        out_specs=pl.BlockSpec((batch_block, H, W, Cout), lambda b: (b, 0, 0, 0)),
        scratch_shapes=[pltpu.VMEM((batch_block, H + 2, W + 2, P), jnp.bfloat16),
                        pltpu.VMEM((batch_block, H, W, 9 * LP), jnp.bfloat16)],
        compiler_params=pltpu.CompilerParams(
            dimension_semantics=("parallel",),       # megacore sharding on v7x
            vmem_limit_bytes=int(vmem_limit)),
        cost_estimate=cost,
    )(x_nhwc, w1, w2, w3, b3, s1, t1, t2, t3)


def bottleneck_forward(x_nchw, params, **kwargs):
    """NCHW interface-compat wrapper (matches the PyTorch module signature).

    Production code should call bottleneck_forward_nhwc directly: the kernel is
    HBM-bound at ResNet shapes and each transpose here is a full extra HBM round
    trip."""
    x = jnp.transpose(x_nchw, (0, 2, 3, 1))
    y = bottleneck_forward_nhwc(x, params, **kwargs)
    return jnp.transpose(y, (0, 3, 1, 2))


if __name__ == "__main__":
    # Small shapes consistent with Bottleneck(inplanes=16, planes=4), identity
    # residual (inplanes == 4*planes). NOTE: toy widths (<128 lanes) -- see NOTE
    # in the module docstring about benchmarking.
    inplanes, planes = 16, 4
    N, H, W = 8, 8, 8
    eps = 1e-5

    key = jax.random.PRNGKey(0)
    keys = jax.random.split(key, 10)

    # Conv weights in PyTorch OIHW convention (deterministic init).
    w1_oihw = 0.1 * jax.random.normal(keys[0], (planes, inplanes, 1, 1), jnp.float32)
    b1 = 0.1 * jax.random.normal(keys[1], (planes,), jnp.float32)
    w2_oihw = 0.1 * jax.random.normal(keys[2], (planes, planes, 3, 3), jnp.float32)
    b2 = 0.1 * jax.random.normal(keys[3], (planes,), jnp.float32)
    w3_oihw = 0.1 * jax.random.normal(keys[4], (planes * 4, planes, 1, 1), jnp.float32)
    b3 = 0.1 * jax.random.normal(keys[5], (planes * 4,), jnp.float32)

    def bn_params(k, c):
        kg, kb, km, kv = jax.random.split(k, 4)
        gamma = 1.0 + 0.1 * jax.random.normal(kg, (c,), jnp.float32)
        beta = 0.1 * jax.random.normal(kb, (c,), jnp.float32)
        mean = 0.1 * jax.random.normal(km, (c,), jnp.float32)
        var = jax.random.uniform(kv, (c,), jnp.float32, minval=0.5, maxval=1.5)
        scale = gamma / jnp.sqrt(var + eps)
        shift = beta - mean * scale
        return scale, shift

    s1, t1 = bn_params(keys[6], inplanes)   # bn1 over inplanes
    s2, t2 = bn_params(keys[7], planes)     # bn2 over planes
    s3, t3 = bn_params(keys[8], planes)     # bn3 over planes

    params = prepare_params(w1_oihw, b1, w2_oihw, b2, w3_oihw, b3,
                            s1, t1, s2, t2, s3, t3)

    # Production path: NHWC end-to-end, bf16 activations in and out.
    x_nhwc = jax.random.normal(keys[9], (N, H, W, inplanes),
                               jnp.float32).astype(jnp.bfloat16)

    out = jax.block_until_ready(bottleneck_forward_nhwc(x_nhwc, params))
    assert out.shape == (N, H, W, planes * 4)
    assert out.dtype == jnp.bfloat16

    # Pure-JAX f32 reference (NCHW, matches the PyTorch forward in eval mode),
    # evaluated on the bf16-rounded input so only internal bf16 error is measured.
    x_nchw = jnp.transpose(x_nhwc.astype(jnp.float32), (0, 3, 1, 2))

    def ref_forward(x):
        dn = ('NCHW', 'OIHW', 'NCHW')

        def bn(h, s, t):
            return h * s[None, :, None, None] + t[None, :, None, None]

        h = jnp.maximum(bn(x, s1, t1), 0.0)
        h = lax.conv_general_dilated(h, w1_oihw, (1, 1), 'VALID',
                                     dimension_numbers=dn) + b1[None, :, None, None]
        h = jnp.maximum(bn(h, s2, t2), 0.0)
        h = lax.conv_general_dilated(h, w2_oihw, (1, 1), ((1, 1), (1, 1)),
                                     dimension_numbers=dn) + b2[None, :, None, None]
        h = jnp.maximum(bn(h, s3, t3), 0.0)
        h = lax.conv_general_dilated(h, w3_oihw, (1, 1), 'VALID',
                                     dimension_numbers=dn) + b3[None, :, None, None]
        return h + x

    ref = jnp.transpose(jax.block_until_ready(ref_forward(x_nchw)), (0, 2, 3, 1))
    out_f32 = out.astype(jnp.float32)
    max_err = jnp.max(jnp.abs(out_f32 - ref))
    # Matmuls run in bf16 (f32 acc) and the output is stored as bf16, so compare
    # against the f32 reference with a correspondingly loosened tolerance.
    assert jnp.allclose(out_f32, ref, atol=5e-2, rtol=5e-2), \
        f"max abs err {max_err}"

    print("KERNEL_OK")
</pallas_src>

<mosaic_0001>
module attributes {stable_mosaic.version = 11 : i64} {
  func.func @bottleneck_kernel(%arg0: i32, %arg1: memref<1x8x8x16xbf16, #tpu.memory_space<vmem>>, %arg2: memref<16x4xbf16, #tpu.memory_space<vmem>>, %arg3: memref<1152x4xbf16, #tpu.memory_space<vmem>>, %arg4: memref<4x16xbf16, #tpu.memory_space<vmem>>, %arg5: memref<1x16xf32, #tpu.memory_space<vmem>>, %arg6: memref<1x16xf32, #tpu.memory_space<vmem>>, %arg7: memref<1x16xf32, #tpu.memory_space<vmem>>, %arg8: memref<1x4xf32, #tpu.memory_space<vmem>>, %arg9: memref<1x4xf32, #tpu.memory_space<vmem>>, %arg10: memref<1x8x8x16xbf16, #tpu.memory_space<vmem>>, %arg11: memref<1x10x10x4xbf16, #tpu.memory_space<vmem>>, %arg12: memref<1x8x8x1152xbf16, #tpu.memory_space<vmem>>) attributes {dimension_semantics = [#tpu.dimension_semantics<parallel>], iteration_bounds = array<i64: 8>, scalar_prefetch = 0 : i64, scratch_operands = 2 : i64, tpu.core_type = #tpu.core_type<tc>, window_params = [{transform_indices = @transform_0, window_bounds = array<i64: 1, 8, 8, 16>}, {pipeline_mode = #tpu.pipeline_mode<synchronous>, transform_indices = @transform_1, window_bounds = array<i64: 16, 4>}, {pipeline_mode = #tpu.pipeline_mode<synchronous>, transform_indices = @transform_2, window_bounds = array<i64: 1152, 4>}, {pipeline_mode = #tpu.pipeline_mode<synchronous>, transform_indices = @transform_3, window_bounds = array<i64: 4, 16>}, {pipeline_mode = #tpu.pipeline_mode<synchronous>, transform_indices = @transform_4, window_bounds = array<i64: 1, 16>}, {pipeline_mode = #tpu.pipeline_mode<synchronous>, transform_indices = @transform_5, window_bounds = array<i64: 1, 16>}, {pipeline_mode = #tpu.pipeline_mode<synchronous>, transform_indices = @transform_6, window_bounds = array<i64: 1, 16>}, {pipeline_mode = #tpu.pipeline_mode<synchronous>, transform_indices = @transform_7, window_bounds = array<i64: 1, 4>}, {pipeline_mode = #tpu.pipeline_mode<synchronous>, transform_indices = @transform_8, window_bounds = array<i64: 1, 4>}, {transform_indices = @transform_9, window_bounds = array<i64: 1, 8, 8, 16>}]} {
    %c0 = arith.constant 0 : index
    %c0_0 = arith.constant 0 : index
    %c0_1 = arith.constant 0 : index
    %c0_2 = arith.constant 0 : index
    %0 = vector.load %arg1[%c0, %c0_0, %c0_1, %c0_2] : memref<1x8x8x16xbf16, #tpu.memory_space<vmem>>, vector<1x8x8x16xbf16>
    %1 = arith.extf %0 : vector<1x8x8x16xbf16> to vector<1x8x8x16xf32>
    %2 = vector.shape_cast %1 : vector<1x8x8x16xf32> to vector<64x16xf32>
    %c0_3 = arith.constant 0 : index
    %c0_4 = arith.constant 0 : index
    %3 = vector.load %arg6[%c0_3, %c0_4] : memref<1x16xf32, #tpu.memory_space<vmem>>, vector<1x16xf32>
    %4 = vector.broadcast %3 : vector<1x16xf32> to vector<64x16xf32>
    %5 = arith.mulf %2, %4 : vector<64x16xf32>
    %c0_5 = arith.constant 0 : index
    %c0_6 = arith.constant 0 : index
    %6 = vector.load %arg7[%c0_5, %c0_6] : memref<1x16xf32, #tpu.memory_space<vmem>>, vector<1x16xf32>
    %7 = vector.broadcast %6 : vector<1x16xf32> to vector<64x16xf32>
    %8 = arith.addf %5, %7 : vector<64x16xf32>
    %cst = arith.constant 0.000000e+00 : f32
    %9 = vector.broadcast %cst : f32 to vector<64x16xf32>
    %10 = arith.maximumf %8, %9 : vector<64x16xf32>
    %11 = arith.truncf %10 : vector<64x16xf32> to vector<64x16xbf16>
    %c0_7 = arith.constant 0 : index
    %c0_8 = arith.constant 0 : index
    %12 = vector.load %arg2[%c0_7, %c0_8] : memref<16x4xbf16, #tpu.memory_space<vmem>>, vector<16x4xbf16>
    %cst_9 = arith.constant dense<0.000000e+00> : vector<64x4xf32>
    %13 = tpu.matmul %11, %12, %cst_9 {dimension_numbers = #tpu.dot_dimension_numbers<[1], [0], [0], [1], [0, 0, 1, 1], [], []>} : vector<64x16xbf16>, vector<16x4xbf16>, vector<64x4xf32> -> vector<64x4xf32>
    %c0_10 = arith.constant 0 : index
    %c0_11 = arith.constant 0 : index
    %14 = vector.load %arg8[%c0_10, %c0_11] : memref<1x4xf32, #tpu.memory_space<vmem>>, vector<1x4xf32>
    %15 = vector.broadcast %14 : vector<1x4xf32> to vector<64x4xf32>
    %16 = arith.addf %13, %15 : vector<64x4xf32>
    %cst_12 = arith.constant 0.000000e+00 : f32
    %17 = vector.broadcast %cst_12 : f32 to vector<64x4xf32>
    %18 = arith.maximumf %16, %17 : vector<64x4xf32>
    %cst_13 = arith.constant 0.000000e+00 : bf16
    %19 = vector.broadcast %cst_13 : bf16 to vector<1x1x10x4xbf16>
    %c0_14 = arith.constant 0 : index
    %c0_15 = arith.constant 0 : index
    %c0_16 = arith.constant 0 : index
    %c0_17 = arith.constant 0 : index
    %20 = vector.load %arg11[%c0_14, %c0_15, %c0_16, %c0_17] : memref<1x10x10x4xbf16, #tpu.memory_space<vmem>>, vector<1x1x10x4xbf16>
    tpu.vector_store %arg11[%c0_14, %c0_15, %c0_16, %c0_17], %19 {strides = array<i32>} : memref<1x10x10x4xbf16, #tpu.memory_space<vmem>>, vector<1x1x10x4xbf16>,
    %cst_18 = arith.constant 0.000000e+00 : bf16
    %21 = vector.broadcast %cst_18 : bf16 to vector<1x1x10x4xbf16>
    %c0_19 = arith.constant 0 : index
    %c9 = arith.constant 9 : index
    %c0_20 = arith.constant 0 : index
    %c0_21 = arith.constant 0 : index
    %22 = vector.load %arg11[%c0_19, %c9, %c0_20, %c0_21] : memref<1x10x10x4xbf16, #tpu.memory_space<vmem>>, vector<1x1x10x4xbf16>
    tpu.vector_store %arg11[%c0_19, %c9, %c0_20, %c0_21], %21 {strides = array<i32>} : memref<1x10x10x4xbf16, #tpu.memory_space<vmem>>, vector<1x1x10x4xbf16>,
    %cst_22 = arith.constant 0.000000e+00 : bf16
    %23 = vector.broadcast %cst_22 : bf16 to vector<1x10x1x4xbf16>
    %c0_23 = arith.constant 0 : index
    %c0_24 = arith.constant 0 : index
    %c0_25 = arith.constant 0 : index
    %c0_26 = arith.constant 0 : index
    %24 = vector.load %arg11[%c0_23, %c0_24, %c0_25, %c0_26] : memref<1x10x10x4xbf16, #tpu.memory_space<vmem>>, vector<1x10x1x4xbf16>
    tpu.vector_store %arg11[%c0_23, %c0_24, %c0_25, %c0_26], %23 {strides = array<i32>} : memref<1x10x10x4xbf16, #tpu.memory_space<vmem>>, vector<1x10x1x4xbf16>,
    %cst_27 = arith.constant 0.000000e+00 : bf16
    %25 = vector.broadcast %cst_27 : bf16 to vector<1x10x1x4xbf16>
    %c0_28 = arith.constant 0 : index
    %c0_29 = arith.constant 0 : index
    %c9_30 = arith.constant 9 : index
    %c0_31 = arith.constant 0 : index
    %26 = vector.load %arg11[%c0_28, %c0_29, %c9_30, %c0_31] : memref<1x10x10x4xbf16, #tpu.memory_space<vmem>>, vector<1x10x1x4xbf16>
    tpu.vector_store %arg11[%c0_28, %c0_29, %c9_30, %c0_31], %25 {strides = array<i32>} : memref<1x10x10x4xbf16, #tpu.memory_space<vmem>>, vector<1x10x1x4xbf16>,
    %27 = arith.truncf %18 : vector<64x4xf32> to vector<64x4xbf16>
    %28 = vector.shape_cast %27 : vector<64x4xbf16> to vector<1x8x8x4xbf16>
    %c0_32 = arith.constant 0 : index
    %c1 = arith.constant 1 : index
    %c1_33 = arith.constant 1 : index
    %c0_34 = arith.constant 0 : index
    %29 = vector.load %arg11[%c0_32, %c1, %c1_33, %c0_34] : memref<1x10x10x4xbf16, #tpu.memory_space<vmem>>, vector<1x8x8x4xbf16>
    tpu.vector_store %arg11[%c0_32, %c1, %c1_33, %c0_34], %28 {strides = array<i32>} : memref<1x10x10x4xbf16, #tpu.memory_space<vmem>>, vector<1x8x8x4xbf16>,
    %cst_35 = arith.constant 0.000000e+00 : bf16
    %30 = vector.broadcast %cst_35 : bf16 to vector<1x8x8x1152xbf16>
    %c0_36 = arith.constant 0 : index
    %c0_37 = arith.constant 0 : index
    %c0_38 = arith.constant 0 : index
    %c0_39 = arith.constant 0 : index
    %31 = vector.load %arg12[%c0_36, %c0_37, %c0_38, %c0_39] : memref<1x8x8x1152xbf16, #tpu.memory_space<vmem>>, vector<1x8x8x1152xbf16>
    tpu.vector_store %arg12[%c0_36, %c0_37, %c0_38, %c0_39], %30 {strides = array<i32>} : memref<1x8x8x1152xbf16, #tpu.memory_space<vmem>>, vector<1x8x8x1152xbf16>,
    %c0_40 = arith.constant 0 : index
    %c0_41 = arith.constant 0 : index
    %c0_42 = arith.constant 0 : index
    %c0_43 = arith.constant 0 : index
    %32 = vector.load %arg11[%c0_40, %c0_41, %c0_42, %c0_43] : memref<1x10x10x4xbf16, #tpu.memory_space<vmem>>, vector<1x8x8x4xbf16>
    %c0_44 = arith.constant 0 : index
    %c0_45 = arith.constant 0 : index
    %c0_46 = arith.constant 0 : index
    %c0_47 = arith.constant 0 : index
    %33 = vector.load %arg12[%c0_44, %c0_45, %c0_46, %c0_47] : memref<1x8x8x1152xbf16, #tpu.memory_space<vmem>>, vector<1x8x8x4xbf16>
    tpu.vector_store %arg12[%c0_44, %c0_45, %c0_46, %c0_47], %32 {strides = array<i32>} : memref<1x8x8x1152xbf16, #tpu.memory_space<vmem>>, vector<1x8x8x4xbf16>,
    %c0_48 = arith.constant 0 : index
    %c0_49 = arith.constant 0 : index
    %c1_50 = arith.constant 1 : index
    %c0_51 = arith.constant 0 : index
    %34 = vector.load %arg11[%c0_48, %c0_49, %c1_50, %c0_51] : memref<1x10x10x4xbf16, #tpu.memory_space<vmem>>, vector<1x8x8x4xbf16>
    %c0_52 = arith.constant 0 : index
    %c0_53 = arith.constant 0 : index
    %c0_54 = arith.constant 0 : index
    %c128 = arith.constant 128 : index
    %35 = vector.load %arg12[%c0_52, %c0_53, %c0_54, %c128] : memref<1x8x8x1152xbf16, #tpu.memory_space<vmem>>, vector<1x8x8x4xbf16>
    tpu.vector_store %arg12[%c0_52, %c0_53, %c0_54, %c128], %34 {strides = array<i32>} : memref<1x8x8x1152xbf16, #tpu.memory_space<vmem>>, vector<1x8x8x4xbf16>,
    %c0_55 = arith.constant 0 : index
    %c0_56 = arith.constant 0 : index
    %c2 = arith.constant 2 : index
    %c0_57 = arith.constant 0 : index
    %36 = vector.load %arg11[%c0_55, %c0_56, %c2, %c0_57] : memref<1x10x10x4xbf16, #tpu.memory_space<vmem>>, vector<1x8x8x4xbf16>
    %c0_58 = arith.constant 0 : index
    %c0_59 = arith.constant 0 : index
    %c0_60 = arith.constant 0 : index
    %c256 = arith.constant 256 : index
    %37 = vector.load %arg12[%c0_58, %c0_59, %c0_60, %c256] : memref<1x8x8x1152xbf16, #tpu.memory_space<vmem>>, vector<1x8x8x4xbf16>
    tpu.vector_store %arg12[%c0_58, %c0_59, %c0_60, %c256], %36 {strides = array<i32>} : memref<1x8x8x1152xbf16, #tpu.memory_space<vmem>>, vector<1x8x8x4xbf16>,
    %c0_61 = arith.constant 0 : index
    %c1_62 = arith.constant 1 : index
    %c0_63 = arith.constant 0 : index
    %c0_64 = arith.constant 0 : index
    %38 = vector.load %arg11[%c0_61, %c1_62, %c0_63, %c0_64] : memref<1x10x10x4xbf16, #tpu.memory_space<vmem>>, vector<1x8x8x4xbf16>
    %c0_65 = arith.constant 0 : index
    %c0_66 = arith.constant 0 : index
    %c0_67 = arith.constant 0 : index
    %c384 = arith.constant 384 : index
    %39 = vector.load %arg12[%c0_65, %c0_66, %c0_67, %c384] : memref<1x8x8x1152xbf16, #tpu.memory_space<vmem>>, vector<1x8x8x4xbf16>
    tpu.vector_store %arg12[%c0_65, %c0_66, %c0_67, %c384], %38 {strides = array<i32>} : memref<1x8x8x1152xbf16, #tpu.memory_space<vmem>>, vector<1x8x8x4xbf16>,
    %c0_68 = arith.constant 0 : index
    %c1_69 = arith.constant 1 : index
    %c1_70 = arith.constant 1 : index
    %c0_71 = arith.constant 0 : index
    %40 = vector.load %arg11[%c0_68, %c1_69, %c1_70, %c0_71] : memref<1x10x10x4xbf16, #tpu.memory_space<vmem>>, vector<1x8x8x4xbf16>
    %c0_72 = arith.constant 0 : index
    %c0_73 = arith.constant 0 : index
    %c0_74 = arith.constant 0 : index
    %c512 = arith.constant 512 : index
    %41 = vector.load %arg12[%c0_72, %c0_73, %c0_74, %c512] : memref<1x8x8x1152xbf16, #tpu.memory_space<vmem>>, vector<1x8x8x4xbf16>
    tpu.vector_store %arg12[%c0_72, %c0_73, %c0_74, %c512], %40 {strides = array<i32>} : memref<1x8x8x1152xbf16, #tpu.memory_space<vmem>>, vector<1x8x8x4xbf16>,
    %c0_75 = arith.constant 0 : index
    %c1_76 = arith.constant 1 : index
    %c2_77 = arith.constant 2 : index
    %c0_78 = arith.constant 0 : index
    %42 = vector.load %arg11[%c0_75, %c1_76, %c2_77, %c0_78] : memref<1x10x10x4xbf16, #tpu.memory_space<vmem>>, vector<1x8x8x4xbf16>
    %c0_79 = arith.constant 0 : index
    %c0_80 = arith.constant 0 : index
    %c0_81 = arith.constant 0 : index
    %c640 = arith.constant 640 : index
    %43 = vector.load %arg12[%c0_79, %c0_80, %c0_81, %c640] : memref<1x8x8x1152xbf16, #tpu.memory_space<vmem>>, vector<1x8x8x4xbf16>
    tpu.vector_store %arg12[%c0_79, %c0_80, %c0_81, %c640], %42 {strides = array<i32>} : memref<1x8x8x1152xbf16, #tpu.memory_space<vmem>>, vector<1x8x8x4xbf16>,
    %c0_82 = arith.constant 0 : index
    %c2_83 = arith.constant 2 : index
    %c0_84 = arith.constant 0 : index
    %c0_85 = arith.constant 0 : index
    %44 = vector.load %arg11[%c0_82, %c2_83, %c0_84, %c0_85] : memref<1x10x10x4xbf16, #tpu.memory_space<vmem>>, vector<1x8x8x4xbf16>
    %c0_86 = arith.constant 0 : index
    %c0_87 = arith.constant 0 : index
    %c0_88 = arith.constant 0 : index
    %c768 = arith.constant 768 : index
    %45 = vector.load %arg12[%c0_86, %c0_87, %c0_88, %c768] : memref<1x8x8x1152xbf16, #tpu.memory_space<vmem>>, vector<1x8x8x4xbf16>
    tpu.vector_store %arg12[%c0_86, %c0_87, %c0_88, %c768], %44 {strides = array<i32>} : memref<1x8x8x1152xbf16, #tpu.memory_space<vmem>>, vector<1x8x8x4xbf16>,
    %c0_89 = arith.constant 0 : index
    %c2_90 = arith.constant 2 : index
    %c1_91 = arith.constant 1 : index
    %c0_92 = arith.constant 0 : index
    %46 = vector.load %arg11[%c0_89, %c2_90, %c1_91, %c0_92] : memref<1x10x10x4xbf16, #tpu.memory_space<vmem>>, vector<1x8x8x4xbf16>
    %c0_93 = arith.constant 0 : index
    %c0_94 = arith.constant 0 : index
    %c0_95 = arith.constant 0 : index
    %c896 = arith.constant 896 : index
    %47 = vector.load %arg12[%c0_93, %c0_94, %c0_95, %c896] : memref<1x8x8x1152xbf16, #tpu.memory_space<vmem>>, vector<1x8x8x4xbf16>
    tpu.vector_store %arg12[%c0_93, %c0_94, %c0_95, %c896], %46 {strides = array<i32>} : memref<1x8x8x1152xbf16, #tpu.memory_space<vmem>>, vector<1x8x8x4xbf16>,
    %c0_96 = arith.constant 0 : index
    %c2_97 = arith.constant 2 : index
    %c2_98 = arith.constant 2 : index
    %c0_99 = arith.constant 0 : index
    %48 = vector.load %arg11[%c0_96, %c2_97, %c2_98, %c0_99] : memref<1x10x10x4xbf16, #tpu.memory_space<vmem>>, vector<1x8x8x4xbf16>
    %c0_100 = arith.constant 0 : index
    %c0_101 = arith.constant 0 : index
    %c0_102 = arith.constant 0 : index
    %c1024 = arith.constant 1024 : index
    %49 = vector.load %arg12[%c0_100, %c0_101, %c0_102, %c1024] : memref<1x8x8x1152xbf16, #tpu.memory_space<vmem>>, vector<1x8x8x4xbf16>
    tpu.vector_store %arg12[%c0_100, %c0_101, %c0_102, %c1024], %48 {strides = array<i32>} : memref<1x8x8x1152xbf16, #tpu.memory_space<vmem>>, vector<1x8x8x4xbf16>,
    %c0_103 = arith.constant 0 : index
    %c0_104 = arith.constant 0 : index
    %c0_105 = arith.constant 0 : index
    %c0_106 = arith.constant 0 : index
    %50 = vector.load %arg12[%c0_103, %c0_104, %c0_105, %c0_106] : memref<1x8x8x1152xbf16, #tpu.memory_space<vmem>>, vector<1x8x8x1152xbf16>
    %51 = vector.shape_cast %50 : vector<1x8x8x1152xbf16> to vector<64x1152xbf16>
    %c0_107 = arith.constant 0 : index
    %c0_108 = arith.constant 0 : index
    %52 = vector.load %arg3[%c0_107, %c0_108] : memref<1152x4xbf16, #tpu.memory_space<vmem>>, vector<1152x4xbf16>
    %cst_109 = arith.constant dense<0.000000e+00> : vector<64x4xf32>
    %53 = tpu.matmul %51, %52, %cst_109 {dimension_numbers = #tpu.dot_dimension_numbers<[1], [0], [0], [1], [0, 0, 1, 1], [], []>} : vector<64x1152xbf16>, vector<1152x4xbf16>, vector<64x4xf32> -> vector<64x4xf32>
    %c0_110 = arith.constant 0 : index
    %c0_111 = arith.constant 0 : index
    %54 = vector.load %arg9[%c0_110, %c0_111] : memref<1x4xf32, #tpu.memory_space<vmem>>, vector<1x4xf32>
    %55 = vector.broadcast %54 : vector<1x4xf32> to vector<64x4xf32>
    %56 = arith.addf %53, %55 : vector<64x4xf32>
    %cst_112 = arith.constant 0.000000e+00 : f32
    %57 = vector.broadcast %cst_112 : f32 to vector<64x4xf32>
    %58 = arith.maximumf %56, %57 : vector<64x4xf32>
    %59 = arith.truncf %58 : vector<64x4xf32> to vector<64x4xbf16>
    %c0_113 = arith.constant 0 : index
    %c0_114 = arith.constant 0 : index
    %60 = vector.load %arg4[%c0_113, %c0_114] : memref<4x16xbf16, #tpu.memory_space<vmem>>, vector<4x16xbf16>
    %cst_115 = arith.constant dense<0.000000e+00> : vector<64x16xf32>
    %61 = tpu.matmul %59, %60, %cst_115 {dimension_numbers = #tpu.dot_dimension_numbers<[1], [0], [0], [1], [0, 0, 1, 1], [], []>} : vector<64x4xbf16>, vector<4x16xbf16>, vector<64x16xf32> -> vector<64x16xf32>
    %c0_116 = arith.constant 0 : index
    %c0_117 = arith.constant 0 : index
    %62 = vector.load %arg5[%c0_116, %c0_117] : memref<1x16xf32, #tpu.memory_space<vmem>>, vector<1x16xf32>
    %63 = vector.broadcast %62 : vector<1x16xf32> to vector<64x16xf32>
    %64 = arith.addf %61, %63 : vector<64x16xf32>
    %c0_118 = arith.constant 0 : index
    %c0_119 = arith.constant 0 : index
    %c0_120 = arith.constant 0 : index
    %c0_121 = arith.constant 0 : index
    %65 = vector.load %arg1[%c0_118, %c0_119, %c0_120, %c0_121] : memref<1x8x8x16xbf16, #tpu.memory_space<vmem>>, vector<1x8x8x16xbf16>
    %66 = arith.extf %65 : vector<1x8x8x16xbf16> to vector<1x8x8x16xf32>
    %67 = vector.shape_cast %66 : vector<1x8x8x16xf32> to vector<64x16xf32>
    %68 = arith.addf %64, %67 : vector<64x16xf32>
    %69 = vector.shape_cast %68 : vector<64x16xf32> to vector<1x8x8x16xf32>
    %70 = arith.truncf %69 : vector<1x8x8x16xf32> to vector<1x8x8x16xbf16>
    %c0_122 = arith.constant 0 : index
    %c0_123 = arith.constant 0 : index
    %c0_124 = arith.constant 0 : index
    %c0_125 = arith.constant 0 : index
    %71 = vector.load %arg10[%c0_122, %c0_123, %c0_124, %c0_125] : memref<1x8x8x16xbf16, #tpu.memory_space<vmem>>, vector<1x8x8x16xbf16>
    tpu.vector_store %arg10[%c0_122, %c0_123, %c0_124, %c0_125], %70 {strides = array<i32>} : memref<1x8x8x16xbf16, #tpu.memory_space<vmem>>, vector<1x8x8x16xbf16>,
    return
  }
  func.func @transform_0(%arg0: i32) -> (i32, i32, i32, i32) {
    %c0_i32 = arith.constant 0 : i32
    %c0_i32_0 = arith.constant 0 : i32
    %c0_i32_1 = arith.constant 0 : i32
    %c0_i32_2 = arith.constant 0 : i32
    return %arg0, %c0_i32, %c0_i32_0, %c0_i32_1 : i32, i32, i32, i32
  }
  func.func @transform_1(%arg0: i32) -> (i32, i32) {
    %c0_i32 = arith.constant 0 : i32
    %c0_i32_0 = arith.constant 0 : i32
    %c0_i32_1 = arith.constant 0 : i32
    return %c0_i32, %c0_i32_0 : i32, i32
  }
  func.func @transform_2(%arg0: i32) -> (i32, i32) {
    %c0_i32 = arith.constant 0 : i32
    %c0_i32_0 = arith.constant 0 : i32
    %c0_i32_1 = arith.constant 0 : i32
    return %c0_i32, %c0_i32_0 : i32, i32
  }
  func.func @transform_3(%arg0: i32) -> (i32, i32) {
    %c0_i32 = arith.constant 0 : i32
    %c0_i32_0 = arith.constant 0 : i32
    %c0_i32_1 = arith.constant 0 : i32
    return %c0_i32, %c0_i32_0 : i32, i32
  }
  func.func @transform_4(%arg0: i32) -> (i32, i32) {
    %c0_i32 = arith.constant 0 : i32
    %c0_i32_0 = arith.constant 0 : i32
    %c0_i32_1 = arith.constant 0 : i32
    return %c0_i32, %c0_i32_0 : i32, i32
  }
  func.func @transform_5(%arg0: i32) -> (i32, i32) {
    %c0_i32 = arith.constant 0 : i32
    %c0_i32_0 = arith.constant 0 : i32
    %c0_i32_1 = arith.constant 0 : i32
    return %c0_i32, %c0_i32_0 : i32, i32
  }
  func.func @transform_6(%arg0: i32) -> (i32, i32) {
    %c0_i32 = arith.constant 0 : i32
    %c0_i32_0 = arith.constant 0 : i32
    %c0_i32_1 = arith.constant 0 : i32
    return %c0_i32, %c0_i32_0 : i32, i32
  }
  func.func @transform_7(%arg0: i32) -> (i32, i32) {
    %c0_i32 = arith.constant 0 : i32
    %c0_i32_0 = arith.constant 0 : i32
    %c0_i32_1 = arith.constant 0 : i32
    return %c0_i32, %c0_i32_0 : i32, i32
  }
  func.func @transform_8(%arg0: i32) -> (i32, i32) {
    %c0_i32 = arith.constant 0 : i32
    %c0_i32_0 = arith.constant 0 : i32
    %c0_i32_1 = arith.constant 0 : i32
    return %c0_i32, %c0_i32_0 : i32, i32
  }
  func.func @transform_9(%arg0: i32) -> (i32, i32, i32, i32) {
    %c0_i32 = arith.constant 0 : i32
    %c0_i32_0 = arith.constant 0 : i32
    %c0_i32_1 = arith.constant 0 : i32
    %c0_i32_2 = arith.constant 0 : i32
    return %arg0, %c0_i32, %c0_i32_0, %c0_i32_1 : i32, i32, i32, i32
  }
}

</mosaic_0001>

<bundles_post_ra>
// kernel: tpu_custom_call.1
= control target key start
LH: loop header
LB: loop body
LE: loop exit
PB: predicated region body
PF: predicated region fallthrough
CT: control target
= control target key end

     0   :  { %14 = vsyncpa [#allocation5], 0  ;;  %s4262_s0 = inlined_call_operand.vmem [shape: bf16[8,8,8,16], index: 0, kind: input, shape index: {}]   ;;  %s4263_s1 = inlined_call_operand.vmem [shape: bf16[16,4], index: 1, kind: input, shape index: {}]   ;;  %s4264_s2 = inlined_call_operand.vmem [shape: bf16[1152,4], index: 2, kind: input, shape index: {}]   ;;  %s4265_s3 = inlined_call_operand.vmem [shape: bf16[4,16], index: 3, kind: input, shape index: {}]   ;;  %s4266_s4 = inlined_call_operand.vmem [shape: f32[1,16], index: 4, kind: input, shape index: {}]   ;;  %s4267_s5 = inlined_call_operand.vmem [shape: f32[1,16], index: 5, kind: input, shape index: {}]   ;;  %s4268_s6 = inlined_call_operand.vmem [shape: f32[1,16], index: 6, kind: input, shape index: {}]   ;;  %s4269_s7 = inlined_call_operand.vmem [shape: f32[1,4], index: 7, kind: input, shape index: {}]   ;;  %s4270_s8 = inlined_call_operand.vmem [shape: f32[1,4], index: 8, kind: input, shape index: {}]   ;;  %s4271_s9 = inlined_call_operand.hbm [shape: bf16[8,8,8,16], index: 9, kind: output, shape index: {}]  }
   0x1   :  { %16 = vsyncpa [#allocation5 + $0x1], 0  ;;  %s3551_s30 = smov 0   ;;  %s3553_s10 = smov 0  }
   0x2   :  { %s3555_s11 = smov 0   ;;  %s3557_s12 = smov 0  }
   0x3 LB: > { %s3572_s13 = sadd.s32 4294967295, %s3495_s12   ;;  %s2836_s14 = sadd.s32 4294967294, %s3495_s12   ;;  %s3495_s12 = sphi %s3557_s12, %s4287_s12   ;;  %s3491_s11 = sphi %s3555_s11, %s4286_s11   ;;  %s3487_s10 = sphi %s3553_s10, %s4285_s10   ;;  %s3483_s30 = sphi %s3551_s30, %s4284_s30  }
   0x4   : > { %s3576_s15 = sadd.s32 1, %s3495_s12   ;;  %s223_s16 = sadd.s32 1, %s3491_s11 }
   0x5   : > { %s220_s17 = ssub.s32 %s3495_s12, %s3576_s15  ;;  %p233_p0 = scmp.ne.s32.totalorder %s3491_s11, %s3487_s10 }
   0x6   : > { %p221_p1 = scmp.eq.s32.totalorder %s220_s17, 0  ;;  %p234_p2 = scmp.eq.s32.totalorder %s3572_s13, 7 }
   0x7   : > { %p239_p3 = scmp.ne.s32.totalorder %s3487_s10, %s3483_s30  ;;  %p240_p4 = scmp.eq.s32.totalorder %s2836_s14, 7 }
   0x8   : > { %s3587_s18 = scalar_select %p221_p1, %s3491_s11, %s223_s16  }
   0x9   : > { %p3589_p5 = por %p234_p2, %p233_p0  ;;  %p3593_p6 = por %p240_p4, %p239_p3 }
   0xa   : > { %p2839_p7 = scmp.ge.s32.totalorder %s3495_s12, 1  ;;  %p290_p8 = scmp.lt.s32.totalorder %s3495_s12, 9 }
   0xc   : > { %p291_p9 = pnand %p2839_p7, %p290_p8 }
   0xd   : > { %v3319_v0 = vld [vmem:[%s4263_s1] sm:$0xff] (!%p291_p9)   ;;  %p326_p10 = scmp.lt.s32.totalorder (!%p291_p9), %s3572_s13, 7  ;;  %vm405_vm0 = vcmask (!%p291_p9), 130048   ;;  %vm493_vm1 = vcmask (!%p291_p9), 24576   ;;  %vm499_vm2 = vsmask.f32 (!%p291_p9), 256 }
   0xe   : > { %294 = sbr.rel (%p291_p9) target bundleno = 860 (0x35c), region = 56  ;;  %3232 = vmatprep.subr.bf16.mxu0 (!%p291_p9), %v3319_v0  ;;  %v2843_v1 = vld [vmem:[%s4267_s5] ss:$0 sm:$0xff] (!%p291_p9)  ;;  %vm531_vm3 = vsmask.f32 (!%p291_p9), 7938  ;;  %vm491_vm4 = vcmask (!%p291_p9), 27648   ;;  %vm3626_vm5 = vmand (!%p291_p9), %vm493_vm1, %vm499_vm2 }
   0xf   : > { %3233 = vmatpush3.bf16.msra.mxu0 (!%p291_p9), %v3319_v0  ;;  %v2844_v3 = vld [vmem:[%s4268_s6] ss:$0 sm:$0xff] (!%p291_p9)  ;;  %v3497_v43 = vmov (!%p291_p9), 0   ;;  %v510_v45 = vld [vmem:[#allocation2 + $0x18] sm:$0x1] (!%p291_p9)  ;;  %vm3634_vm6 = vmand (!%p291_p9), %vm493_vm1, %vm531_vm3  ;;  %vm953_vm7 = vcmask (!%p291_p9), 1042432  }
  0x10   : > { %494 = vst.msk [vmem:[#allocation2 + $0x4] sm:$0x1] (!%p291_p9), %vm493_vm1, %v3497_v43  ;;  %497 = vst.msk [vmem:[#allocation2 + $0x4c] sm:$0x1] (!%p291_p9), %vm493_vm1, %v3497_v43  ;;  %v542_v46 = vld [vmem:[#allocation2 + $0x1c] sm:$0x1] (!%p291_p9) }
  0x11   : > { %718 = vst [vmem:[#allocation3] sm:$0xff] (!%p291_p9), %v3497_v43  ;;  %719 = vst [vmem:[#allocation3 + $0x8] sm:$0xff] (!%p291_p9), %v3497_v43  ;;  %v511_v47 = vsel (!%p291_p9), %vm3626_vm5, 0, %v510_v45  ;;  %v504_v49 = vld [vmem:[#allocation2 + $0x8] sm:$0x1] (!%p291_p9)  ;;  %v543_v51 = vsel (!%p291_p9), %vm3634_vm6, 0, %v542_v46 }
  0x12   : > { %720 = vst [vmem:[#allocation3 + $0x10] sm:$0xff] (!%p291_p9), %v3497_v43  ;;  %721 = vst [vmem:[#allocation3 + $0x18] sm:$0xff] (!%p291_p9), %v3497_v43  ;;  %v536_v50 = vld [vmem:[#allocation2 + $0xc] sm:$0x1] (!%p291_p9)  ;;  %v505_v52 = vsel (!%p291_p9), %vm3626_vm5, 0, %v504_v49  ;;  %v3320_v55 = vld [vmem:[%s4264_s2 + $0xc0] sm:$0xff] (!%p291_p9)  }
  0x13   : > { %722 = vst [vmem:[#allocation3 + $0x20] sm:$0xf] (!%p291_p9), %v3497_v43  ;;  %723 = vst [vmem:[#allocation3 + $0x24] sm:$0xff] (!%p291_p9), %v3497_v43  ;;  %v537_v53 = vsel (!%p291_p9), %vm3634_vm6, 0, %v536_v50  ;;  %v513_v54 = vld [vmem:[#allocation2 + $0x20] sm:$0x1] (!%p291_p9)  ;;  %3095 = vmatprep.subr.bf16.mxu0 (!%p291_p9), %v3320_v55 }
  0x14   : > { %724 = vst [vmem:[#allocation3 + $0x2c] sm:$0xff] (!%p291_p9), %v3497_v43  ;;  %725 = vst [vmem:[#allocation3 + $0x34] sm:$0xff] (!%p291_p9), %v3497_v43  ;;  %v514_v56 = vsel (!%p291_p9), %vm3626_vm5, 0, %v513_v54  ;;  %v545_v57 = vld [vmem:[#allocation2 + $0x24] sm:$0x1] (!%p291_p9)  ;;  %v3322_v0 = vld [vmem:[%s4264_s2 + $0xc8] sm:$0xff] (!%p291_p9)  }
  0x15   : > { %s327_s23 = scalar_select %p326_p10, %s3572_s13, 7  ;;  %726 = vst [vmem:[#allocation3 + $0x3c] sm:$0xff] %v3497_v43  ;;  %727 = vst [vmem:[#allocation3 + $0x44] sm:$0xf] %v3497_v43  ;;  %v3321_v58 = vld [vmem:[%s4264_s2 + $0x80] sm:$0xff]   ;;  %v546_v59 = vsel %vm3634_vm6, 0, %v545_v57 }
  0x16   : > { %728 = vst [vmem:[#allocation3 + $0x48] sm:$0xff] %v3497_v43  ;;  %729 = vst [vmem:[#allocation3 + $0x50] sm:$0xff] %v3497_v43  ;;  %v507_v60 = vld [vmem:[#allocation2 + $0x10] sm:$0x1]  ;;  %v539_v61 = vld [vmem:[#allocation2 + $0x14] sm:$0x1] }
  0x17   : > { %s3002_s24 = sshll.u32 %s327_s23, 5  ;;  %730 = vst [vmem:[#allocation3 + $0x58] sm:$0xff] %v3497_v43  ;;  %731 = vst [vmem:[#allocation3 + $0x60] sm:$0xff] %v3497_v43  ;;  %v508_v62 = vsel %vm3626_vm5, 0, %v507_v60  ;;  %v540_v63 = vsel %vm3634_vm6, 0, %v539_v61  ;;  %vm954_vm8 = vcmask 1046532  }
  0x18   : > { %s3610_s29 = scalar_lea.vmem %s4262_s0, %s3002_s24  ;;  %732 = vst [vmem:[#allocation3 + $0x68] sm:$0xf] %v3497_v43  ;;  %733 = vst [vmem:[#allocation3 + $0x6c] sm:$0xff] %v3497_v43  ;;  %v3340_v46 = vld [vmem:[%s4264_s2 + $0xa8] sm:$0xff]   ;;  %v3341_v48 = vld [vmem:[%s4264_s2 + $0x20] sm:$0xff]   ;;  %vm2650_vm14 = vcmask 1041408  }
  0x19   : > { %v3013_v2 = vld [vmem:[%s3610_s29] sm:$0xff]   ;;  %v3044_v4 = vld [vmem:[%s3610_s29 + $0x8] sm:$0xff]   ;;  %v3045_v5 = vld [vmem:[%s3610_s29 + $0x10] sm:$0xff]   ;;  %734 = vst [vmem:[#allocation3 + $0x74] sm:$0xff] %v3497_v43  ;;  %vm790_vm10 = vsmask.f32 3328 }
  0x1a   : > { %v3014_v6 = vunpack.c.l.bf16 %v3013_v2  ;;  %v3015_v7 = vunpack.c.h.bf16 %v3013_v2  ;;  %v3018_v8 = vunpack.c.l.bf16 %v3044_v4  ;;  %v3019_v9 = vunpack.c.h.bf16 %v3044_v4  ;;  %v3046_v10 = vld [vmem:[%s3610_s29 + $0x18] sm:$0xff]   ;;  %735 = vst [vmem:[#allocation3 + $0x7c] sm:$0xff] %v3497_v43  ;;  %736 = vst [vmem:[#allocation3 + $0x84] sm:$0xff] %v3497_v43  ;;  %v560_v2 = vld [vmem:[#allocation2 + $0x4c] sm:$0x1]  ;;  %s323_s27 = sand.u32 1, %s3487_s10  }
  0x1b   : > { %v3022_v11 = vunpack.c.l.bf16 %v3045_v5  ;;  %v3023_v12 = vunpack.c.h.bf16 %v3045_v5  ;;  %v3026_v13 = vunpack.c.l.bf16 %v3046_v10  ;;  %v3027_v14 = vunpack.c.h.bf16 %v3046_v10  ;;  %737 = vst [vmem:[#allocation3 + $0x8c] sm:$0xf] %v3497_v43  ;;  %738 = vst [vmem:[#allocation3 + $0x90] sm:$0xff] %v3497_v43  ;;  %v522_v5 = vld [vmem:[#allocation2 + $0x38] sm:$0x1]  ;;  %v3342_v49 = vld [vmem:[%s4264_s2 + $0xf0] sm:$0xff]  }
  0x1c   : > { %v355_v15 = vmul.f32 %v3014_v6, %v2843_v1  ;;  %v356_v16 = vmul.f32 %v3015_v7, %v2843_v1  ;;  %v357_v17 = vmul.f32 %v3018_v8, %v2843_v1  ;;  %v358_v18 = vmul.f32 %v3019_v9, %v2843_v1  ;;  %739 = vst [vmem:[#allocation3 + $0x98] sm:$0xff] %v3497_v43  ;;  %v516_v7 = vld [vmem:[#allocation2 + $0x28] sm:$0x1]  ;;  %v554_v9 = vld [vmem:[#allocation2 + $0x3c] sm:$0x1]  ;;  %vm3730_vm9 = vmor %vm953_vm7, %vm954_vm8  ;;  %s2840_s16 = sshll.u32 %s323_s27, 5 }
  0x1d   : > { %v359_v19 = vmul.f32 %v3022_v11, %v2843_v1  ;;  %v360_v20 = vmul.f32 %v3023_v12, %v2843_v1  ;;  %v361_v21 = vmul.f32 %v3026_v13, %v2843_v1  ;;  %v362_v22 = vmul.f32 %v3027_v14, %v2843_v1  ;;  %740 = vst [vmem:[#allocation3 + $0xa0] sm:$0xff] %v3497_v43  ;;  %v533_v1 = vld [vmem:[#allocation2 + $0x4] sm:$0x1]  ;;  %v3324_v8 = vld [vmem:[%s4264_s2 + $0x88] sm:$0xff]   ;;  %v3344_v50 = vld [vmem:[%s4264_s2 + $0xb0] sm:$0xff]   ;;  %s4192_s17 = scalar_lea.vmem [#allocation4], %s2840_s16 }
  0x1e   : > { %v370_v23 = vadd.f32 %v2844_v3, %v355_v15  ;;  %v371_v24 = vadd.f32 %v2844_v3, %v356_v16  ;;  %v372_v25 = vadd.f32 %v2844_v3, %v357_v17  ;;  %v373_v26 = vadd.f32 %v2844_v3, %v358_v18  ;;  %741 = vst [vmem:[#allocation3 + $0xa8] sm:$0xff] %v3497_v43  ;;  %v3323_v11 = vld [vmem:[%s4264_s2 + $0x40] sm:$0xff]   ;;  %v548_v13 = vld [vmem:[#allocation2 + $0x2c] sm:$0x1]  ;;  %v3326_v17 = vld [vmem:[%s4264_s2 + $0xd0] sm:$0xff]   ;;  %s2774_s21 = sshll.u32 %s4192_s17, 4  ;;  %s4211_s21 = int_to_ptr.vmem [resolvable:$true] %s2774_s21 }
  0x1f   : > { %v374_v27 = vadd.f32 %v2844_v3, %v359_v19  ;;  %v375_v28 = vadd.f32 %v2844_v3, %v360_v20  ;;  %v376_v29 = vadd.f32 %v2844_v3, %v361_v21  ;;  %v377_v30 = vadd.f32 %v2844_v3, %v362_v22  ;;  %742 = vst [vmem:[#allocation3 + $0xb0] sm:$0xf] %v3497_v43  ;;  %v3325_v14 = vld [vmem:[%s4264_s2] sm:$0xff]   ;;  %v3328_v19 = vld [vmem:[%s4264_s2 + $0x90] sm:$0xff]   ;;  %v3327_v20 = vld [vmem:[%s4264_s2 + $0x48] sm:$0xff]   ;;  %s3433_s25 = scalar_lea.vmem %s4211_s21, 512 }
  0x20   : > { %v378_v31 = vmax.f32 %v370_v23, 0.0  ;;  %v379_v32 = vmax.f32 %v371_v24, 0.0  ;;  %v380_v33 = vmax.f32 %v372_v25, 0.0  ;;  %v381_v34 = vmax.f32 %v373_v26, 0.0  ;;  %743 = vst [vmem:[#allocation3 + $0xb4] sm:$0xff] %v3497_v43  ;;  %744 = vst [vmem:[#allocation3 + $0xbc] sm:$0xff] %v3497_v43  ;;  %3055 = vmatprep.subr.bf16.mxu1 %v3323_v11  ;;  %p3434_p11 = scmp.ne.s32.totalorder %s4211_s21, %s3433_s25 }
  0x21   : > { %v382_v35 = vmax.f32 %v374_v27, 0.0  ;;  %v383_v36 = vmax.f32 %v375_v28, 0.0  ;;  %v384_v37 = vmax.f32 %v376_v29, 0.0  ;;  %v385_v38 = vmax.f32 %v377_v30, 0.0  ;;  %745 = vst [vmem:[#allocation3 + $0xc4] sm:$0xff] %v3497_v43  ;;  %746 = vst [vmem:[#allocation3 + $0xcc] sm:$0xff] %v3497_v43  ;;  %3056 = vmatpush3.bf16.msra.mxu1 %v3325_v14 }
  0x22   : > { %v386_v39 = vpack.c.bf16 %v379_v32, %v378_v31  ;;  %v387_v40 = vpack.c.bf16 %v381_v34, %v380_v33  ;;  %747 = vst [vmem:[#allocation3 + $0xd4] sm:$0xf] %v3497_v43  ;;  %748 = vst [vmem:[#allocation3 + $0xd8] sm:$0xff] %v3497_v43  ;;  %v534_v3 = vsel %vm3634_vm6, 0, %v533_v1  ;;  %v561_v4 = vsel %vm3634_vm6, 0, %v560_v2  ;;  %v3329_v23 = vld [vmem:[%s4264_s2 + $0x8] sm:$0xff]   ;;  %3057 = vmatprep.subr.bf16.mxu1 %v3327_v20  ;;  %p3435_p12 = pnand %p3434_p11, %p3589_p5 }
  0x23   : > { %v388_v41 = vpack.c.bf16 %v383_v36, %v382_v35  ;;  %v389_v42 = vpack.c.bf16 %v385_v38, %v384_v37  ;;  %749 = vst [vmem:[#allocation3 + $0xe0] sm:$0xff] %v3497_v43  ;;  %750 = vst [vmem:[#allocation3 + $0xe8] sm:$0xff] %v3497_v43  ;;  %v523_v6 = vsel %vm3626_vm5, 0, %v522_v5  ;;  %v517_v10 = vsel %vm3626_vm5, 0, %v516_v7  ;;  %v525_v16 = vld [vmem:[#allocation2 + $0x40] sm:$0x1] }
  0x24   : > { %3234 = vmatprep.mubr.msk.bf16.mxu0 %vm405_vm0, %v386_v39  ;;  %751 = vst [vmem:[#allocation3 + $0xf0] sm:$0xff] %v3497_v43  ;;  %752 = vst [vmem:[#allocation3 + $0xf8] sm:$0xf] %v3497_v43  ;;  %v555_v12 = vsel %vm3634_vm6, 0, %v554_v9  ;;  %v549_v15 = vsel %vm3634_vm6, 0, %v548_v13  ;;  %v526_v18 = vsel %vm3626_vm5, 0, %v525_v16  ;;  %p3436_p13 = pneg %p3435_p12 }
  0x25   : > { %3235 = vmatmul.mubr.msk.bf16.vlgmr.msra.gmra.mrb[0].mxu0 %vm405_vm0, %v387_v40  ;;  %753 = vst [vmem:[#allocation3 + $0xfc] sm:$0xff] %v3497_v43  ;;  %754 = vst [vmem:[#allocation3 + $0x104] sm:$0xff] %v3497_v43  ;;  %v519_v21 = vld [vmem:[#allocation2 + $0x30] sm:$0x1]  ;;  %v551_v22 = vld [vmem:[#allocation2 + $0x34] sm:$0x1]  ;;  %3058 = vmatpush3.bf16.msra.mxu1 %v3329_v23 }
  0x26   : > { %3238 = vmatprep.mubr.msk.bf16.mxu0 %vm405_vm0, %v388_v41  ;;  %755 = vst [vmem:[#allocation3 + $0x10c] sm:$0xff] %v3497_v43  ;;  %756 = vst [vmem:[#allocation3 + $0x114] sm:$0xff] %v3497_v43  ;;  %3096 = vmatpush3.bf16.msra.mxu0 %v3321_v58  ;;  %v557_v24 = vld [vmem:[#allocation2 + $0x44] sm:$0x1]  ;;  %v520_v25 = vsel %vm3626_vm5, 0, %v519_v21  ;;  %v552_v26 = vsel %vm3634_vm6, 0, %v551_v22 }
  0x27   : > { %757 = vst [vmem:[#allocation3 + $0x11c] sm:$0xf] %v3497_v43  ;;  %492 = vst.msk [vmem:[#allocation2] sm:$0xf] %vm491_vm4, %v3497_v43  ;;  %3097 = vmatprep.subr.bf16.mxu0 %v3322_v0  ;;  %v558_v27 = vsel %vm3634_vm6, 0, %v557_v24  ;;  %v3330_v28 = vld [vmem:[%s4264_s2 + $0xd8] sm:$0xff]  }
  0x28   : > { %496 = vst.msk [vmem:[#allocation2 + $0x48] sm:$0xf] %vm491_vm4, %v3497_v43  ;;  %512 = vst [vmem:[#allocation2 + $0x18] sm:$0x1] %v511_v47  ;;  %v3332_v29 = vld [vmem:[%s4264_s2 + $0x98] sm:$0xff]   ;;  %v3331_v30 = vld [vmem:[%s4264_s2 + $0x50] sm:$0xff]  }
  0x29   : > { %544 = vst [vmem:[#allocation2 + $0x1c] sm:$0x1] %v543_v51  ;;  %506 = vst [vmem:[#allocation2 + $0x8] sm:$0x1] %v505_v52  ;;  %v3333_v31 = vld [vmem:[%s4264_s2 + $0x10] sm:$0xff]   ;;  %3059 = vmatprep.subr.bf16.mxu1 %v3331_v30  ;;  %v3334_v33 = vld [vmem:[%s4264_s2 + $0xe0] sm:$0xff]  }
  0x2a   : > { %538 = vst [vmem:[#allocation2 + $0xc] sm:$0x1] %v537_v53  ;;  %515 = vst [vmem:[#allocation2 + $0x20] sm:$0x1] %v514_v56  ;;  %3098 = vmatpush3.bf16.msra.mxu0 %v3324_v8  ;;  %3060 = vmatpush3.bf16.msra.mxu1 %v3333_v31  ;;  %v3336_v35 = vld [vmem:[%s4264_s2 + $0xa0] sm:$0xff]   ;;  %v3335_v38 = vld [vmem:[%s4264_s2 + $0x58] sm:$0xff]  }
  0x2b   : > { %547 = vst [vmem:[#allocation2 + $0x24] sm:$0x1] %v546_v59  ;;  %509 = vst [vmem:[#allocation2 + $0x10] sm:$0x1] %v508_v62  ;;  %3099 = vmatprep.subr.bf16.mxu0 %v3326_v17  ;;  %v3337_v41 = vld [vmem:[%s4264_s2 + $0x18] sm:$0xff]   ;;  %3061 = vmatprep.subr.bf16.mxu1 %v3335_v38  ;;  %v3338_v43 = vld [vmem:[%s4264_s2 + $0xe8] sm:$0xff]  }
  0x2c   : > { %541 = vst [vmem:[#allocation2 + $0x14] sm:$0x1] %v540_v63  ;;  %535 = vst [vmem:[#allocation2 + $0x4] sm:$0x1] %v534_v3  ;;  %v3339_v47 = vld [vmem:[%s4264_s2 + $0x60] sm:$0xff]   ;;  %v3343_v52 = vld [vmem:[%s4264_s2 + $0x68] sm:$0xff]  }
  0x2d   : > { %3239 = vmatmul.mubr.msk.bf16.gmra.mrb[4].mxu0 %vm405_vm0, %v389_v42  ;;  %562 = vst [vmem:[#allocation2 + $0x4c] sm:$0x1] %v561_v4  ;;  %524 = vst [vmem:[#allocation2 + $0x38] sm:$0x1] %v523_v6  ;;  %v3345_v53 = vld [vmem:[%s4264_s2 + $0x28] sm:$0xff]   ;;  %v3346_v56 = vld [vmem:[%s4264_s2 + $0xf8] sm:$0xff]  }
  0x2e   : > { %518 = vst [vmem:[#allocation2 + $0x28] sm:$0x1] %v517_v10  ;;  %556 = vst [vmem:[#allocation2 + $0x3c] sm:$0x1] %v555_v12  ;;  %3100 = vmatpush3.bf16.msra.mxu0 %v3328_v19  ;;  %v501_v32 = vld [vmem:[#allocation2] sm:$0x1]  ;;  %3062 = vmatpush3.bf16.msra.mxu1 %v3337_v41 }
  0x2f   : > { %550 = vst [vmem:[#allocation2 + $0x2c] sm:$0x1] %v549_v15  ;;  %527 = vst [vmem:[#allocation2 + $0x40] sm:$0x1] %v526_v18  ;;  %3101 = vmatprep.subr.bf16.mxu0 %v3330_v28  ;;  %v502_v34 = vsel %vm3626_vm5, 0, %v501_v32  ;;  %3063 = vmatprep.subr.bf16.mxu1 %v3339_v47  ;;  %v3348_v57 = vld [vmem:[%s4264_s2 + $0xb8] sm:$0xff]  }
  0x30   : > { %521 = vst [vmem:[#allocation2 + $0x30] sm:$0x1] %v520_v25  ;;  %553 = vst [vmem:[#allocation2 + $0x34] sm:$0x1] %v552_v26  ;;  %v921_v36 = vld [vmem:[#allocation2] sm:$0xe] }
  0x31   : > { %559 = vst [vmem:[#allocation2 + $0x44] sm:$0x1] %v558_v27  ;;  %503 = vst [vmem:[#allocation2] sm:$0x1] %v502_v34  ;;  %v2859_v39 = vrot.slane %v921_v36, 9  ;;  %v3347_v61 = vld [vmem:[%s4264_s2 + $0x70] sm:$0xff]  }
  0x32   : > { %3102 = vmatpush3.bf16.msra.mxu0 %v3332_v29  ;;  %3064 = vmatpush3.bf16.msra.mxu1 %v3341_v48  ;;  %v3349_v62 = vld [vmem:[%s4264_s2 + $0x30] sm:$0xff]   ;;  %v3353_v1 = vld [vmem:[%s4264_s2 + $0x1c0] sm:$0xff]   ;;  %v3354_v2 = vld [vmem:[%s4264_s2 + $0x78] sm:$0xff]   ;;  %vm791_vm11 = vsmask.f32 7440  ;;  %vm2637_vm15 = vcmask 31744  }
  0x33   : > { %v922_v37 = vld [vmem:[#allocation2 + $0x4] sm:$0x1]  ;;  %3103 = vmatprep.subr.bf16.mxu0 %v3334_v33  ;;  %3065 = vmatprep.subr.bf16.mxu1 %v3343_v52  ;;  %vm3779_vm12 = vmor %vm790_vm10, %vm791_vm11  ;;  %v3358_v8 = vld [vmem:[%s4264_s2 + $0x38] sm:$0xff]   ;;  %vm2751_vm0 = vcmask 125952   ;;  %s3498_s26 = smov [#allocation4]  }
  0x34   : > { %v958_v40 = vrot.slane %v922_v37, 5  ;;  %v775_v58 = vld [vmem:[#allocation2 + $0x4] sm:$0x1]  ;;  %v528_v10 = vld [vmem:[#allocation2 + $0x48] sm:$0x1]  ;;  %vm3814_vm13 = vmand %vm491_vm4, %vm531_vm3  ;;  %s3437_s28 = sshll.u32 %s3498_s26, 4  ;;  %s3438_s28 = int_to_ptr.vmem [resolvable:$false] %s3437_s28 }
  0x35   : > { %v803_v0 = vshll.u32 %v775_v58, 16  ;;  %v3363_v9 = vld [vmem:[%s4264_s2 + $0x140] sm:$0xff]   ;;  %v529_v11 = vsel %vm3626_vm5, 0, %v528_v10  ;;  %v1276_v15 = vld [vmem:[#allocation2 + $0x4c] sm:$0x1]  ;;  %s3439_s14 = scalar_lea.vmem %s3438_s28, 1024  ;;  %p3440_p0 = scmp.lt.s32.totalorder %s4211_s21, %s3438_s28 }
  0x36   : > { %3104 = vmatpush3.bf16.msra.mxu0 %v3336_v35  ;;  %v959_v45 = vsel %vm3730_vm9, %v2859_v39, %v958_v40  ;;  %3066 = vmatpush3.bf16.msra.mxu1 %v3345_v53  ;;  %530 = vst [vmem:[#allocation2 + $0x48] sm:$0x1] %v529_v11  ;;  %v1385_v20 = vshll.u32 %v1276_v15, 16  ;;  %v1419_v24 = vld [vmem:[#allocation2 + $0x48] sm:$0xe]  ;;  %p3441_p1 = scmp.lt.s32.totalorder %s3439_s14, %s3433_s25 }
  0x37   : > { %996 = vst.msk [vmem:[#allocation3 + $0x8] sm:$0xf] %vm491_vm4, %v959_v45  ;;  %3105 = vmatprep.subr.bf16.mxu0 %v3338_v43  ;;  %3067 = vmatprep.subr.bf16.mxu1 %v3347_v61  ;;  %v805_v6 = vrot.slane %v803_v0, 5  ;;  %v1420_v25 = vld [vmem:[#allocation2 + $0x4c] sm:$0x1]  ;;  %v2882_v26 = vrot.slane %v1419_v24, 9 }
  0x38   : > { %v774_v51 = vld [vmem:[#allocation2] sm:$0xf]  ;;  %v1387_v22 = vrot.slane %v1385_v20, 5  ;;  %v1467_v27 = vrot.slane %v1420_v25, 5  ;;  %v676_v20 = vld [vmem:[#allocation2 + $0x10] sm:$0xf]  ;;  %p3442_p2 = por %p3441_p1, %p3440_p0 }
  0x39   : > { %v794_v54 = vshrl.u32 %v774_v51, 16  ;;  %v797_v55 = vshll.u32 %v774_v51, 16  ;;  %v758_v3 = vld [vmem:[#allocation2] sm:$0xf] }
  0x3a   : > { %3106 = vmatpush3.bf16.msra.mxu0 %v3340_v46  ;;  %3068 = vmatpush3.bf16.msra.mxu1 %v3349_v62  ;;  %766 = vst.msk [vmem:[#allocation3] sm:$0xf] %vm491_vm4, %v758_v3  ;;  %v1468_v28 = vsel %vm3730_vm9, %v2882_v26, %v1467_v27  ;;  %v3805_v29 = vld [vmem:[%s4269_s7] ss:$0 sm:$0xff]  ;;  %p3443_p3 = pnand %p3442_p2, %p3436_p13 }
  0x3b   : > { %3107 = vmatprep.subr.bf16.mxu0 %v3342_v49  ;;  %v796_v59 = vrot.slane %v794_v54, 4  ;;  %v799_v60 = vrot.slane %v797_v55, 5  ;;  %3069 = vmatprep.subr.bf16.mxu1 %v3354_v2  ;;  %1484 = vst.msk [vmem:[#allocation3 + $0x11c] sm:$0xf] %vm491_vm4, %v1468_v28  ;;  %v682_v49 = vld [vmem:[#allocation2 + $0x18] sm:$0xf] }
  0x3d   : > { %v800_v63 = vor.u32 %v799_v60, %v796_v59  ;;  %v1275_v12 = vld [vmem:[#allocation2 + $0x48] sm:$0xf] }
  0x3e   : > { %3108 = vmatpush3.bf16.msra.mxu0 %v3344_v50  ;;  %3070 = vmatpush3.bf16.msra.mxu1 %v3358_v8  ;;  %v1376_v13 = vshrl.u32 %v1275_v12, 16  ;;  %v1379_v14 = vshll.u32 %v1275_v12, 16  ;;  %v1252_v18 = vld [vmem:[#allocation2 + $0x48] sm:$0xf]  ;;  %v685_v50 = vld [vmem:[#allocation2 + $0x1c] sm:$0x1] }
  0x3f   : > { %3109 = vmatprep.subr.bf16.mxu0 %v3346_v56  ;;  %v801_v5 = vrot.slane %v800_v63, 4  ;;  %3135 = vmatprep.subr.bf16.mxu1 %v3363_v9  ;;  %1260 = vst.msk [vmem:[#allocation3 + $0x114] sm:$0xf] %vm491_vm4, %v1252_v18  ;;  %v670_v56 = vld [vmem:[#allocation2 + $0x8] sm:$0xf] }
  0x40   : > { %v1378_v16 = vrot.slane %v1376_v13, 4  ;;  %v1381_v17 = vrot.slane %v1379_v14, 5  ;;  %v673_v63 = vld [vmem:[#allocation2 + $0xc] sm:$0x1]  ;;  %v688_v8 = vld [vmem:[#allocation2 + $0x20] sm:$0xf] }
  0x41   : > { %v806_v7 = vsel %vm3779_vm12, %v801_v5, %v805_v6  ;;  %v691_v13 = vld [vmem:[#allocation2 + $0x24] sm:$0x1] }
  0x42   : > { %3110 = vmatpush3.bf16.msra.mxu0 %v3348_v57  ;;  %913 = vst.msk [vmem:[#allocation3 + $0x4] sm:$0xf] %vm491_vm4, %v806_v7  ;;  %v1382_v19 = vor.u32 %v1381_v17, %v1378_v16 }
  0x43   : > { %3175 = vmatprep.subr.bf16.mxu0 %v3353_v1 }
  0x44   : > { %v1383_v21 = vrot.slane %v1382_v19, 4 }
  0x46   : > { %v1388_v23 = vsel %vm3779_vm12, %v1383_v21, %v1387_v22  ;;  %v679_v21 = vld [vmem:[#allocation2 + $0x14] sm:$0x1] }
  0x47   : > { %1404 = vst.msk [vmem:[#allocation3 + $0x118] sm:$0xf] %vm491_vm4, %v1388_v23 }
  0xf8   : > { %v3236_v30 = vpop.f32.mrb[0].mxu0 }
  0xf9   : > { %v461_v31 = vadd.f32 %v3236_v30, %v3805_v29  ;;  %v452_v32 = vpop.f32.mrb[1].mxu0 }
  0xfa   : > { %v453_v33 = vadd.f32 %v3805_v29, %v452_v32  ;;  %v3237_v34 = vpop.f32.mrb[2].mxu0 }
  0xfb   : > { %v485_v35 = vmax.f32 %v461_v31, 0.0  ;;  %v464_v36 = vadd.f32 %v3237_v34, %v3805_v29  ;;  %v455_v37 = vpop.f32.mrb[3].mxu0 }
  0xfc   : > { %v483_v38 = vmax.f32 %v453_v33, 0.0  ;;  %v456_v39 = vadd.f32 %v3805_v29, %v455_v37 }
  0xfd   : > { %v3005_v40 = vpack.c.bf16 %v485_v35, %v485_v35  ;;  %v486_v41 = vmax.f32 %v464_v36, 0.0 }
  0xfe   : > { %v3003_v43 = vpack.c.bf16 %v483_v38, %v483_v38  ;;  %v484_v45 = vmax.f32 %v456_v39, 0.0 }
  0xff   : > { %v604_v46 = vshrl.u32 %v3005_v40, 16  ;;  %v3006_v47 = vpack.c.bf16 %v486_v41, %v486_v41  ;;  %v607_v48 = vshll.u32 %v3005_v40, 16 }
 0x100   : > { %v588_v51 = vshrl.u32 %v3003_v43, 16  ;;  %v591_v52 = vshll.u32 %v3003_v43, 16  ;;  %v3004_v53 = vpack.c.bf16 %v484_v45, %v484_v45  ;;  %v3240_v54 = vpop.f32.mrb[4].mxu0  ;;  %v706_v45 = vld [vmem:[#allocation2 + $0x38] sm:$0xf] }
 0x101   : > { %v606_v55 = vrot.slane %v604_v46, 7  ;;  %v612_v57 = vshrl.u32 %v3006_v47, 16  ;;  %v615_v58 = vshll.u32 %v3006_v47, 16  ;;  %v477_v59 = vadd.f32 %v3240_v54, %v3805_v29  ;;  %v468_v60 = vpop.f32.mrb[5].mxu0  ;;  %v694_v46 = vld [vmem:[#allocation2 + $0x28] sm:$0xf] }
 0x102   : > { %v590_v62 = vrot.slane %v588_v51, 7  ;;  %v596_v0 = vshrl.u32 %v3004_v53, 16  ;;  %v599_v1 = vshll.u32 %v3004_v53, 16  ;;  %v469_v2 = vadd.f32 %v3805_v29, %v468_v60  ;;  %v3241_v3 = vpop.f32.mrb[6].mxu0  ;;  %v697_v51 = vld [vmem:[#allocation2 + $0x2c] sm:$0x1] }
 0x103   : > { %v609_v5 = vor.u32 %v607_v48, %v606_v55  ;;  %v610_v6 = vrot.slane %v606_v55, 4  ;;  %v614_v7 = vrot.slane %v612_v57, 7  ;;  %v489_v9 = vmax.f32 %v477_v59, 0.0  ;;  %v471_v10 = vpop.f32.mrb[7].mxu0 }
 0x104   : > { %v593_v11 = vor.u32 %v591_v52, %v590_v62  ;;  %v594_v12 = vrot.slane %v590_v62, 4  ;;  %v598_v14 = vrot.slane %v596_v0, 7  ;;  %v487_v15 = vmax.f32 %v469_v2, 0.0  ;;  %v715_v2 = vld [vmem:[#allocation2 + $0x44] sm:$0x1] }
 0x105   : > { %v683_v16 = vsel %vm3814_vm13, %v609_v5, %v682_v49  ;;  %v686_v17 = vsel %vm3626_vm5, %v610_v6, %v685_v50  ;;  %v617_v18 = vor.u32 %v615_v58, %v614_v7  ;;  %v618_v19 = vrot.slane %v614_v7, 4  ;;  %v709_v49 = vld [vmem:[#allocation2 + $0x3c] sm:$0x1] }
 0x106   : > { %684 = vst [vmem:[#allocation2 + $0x18] sm:$0xf] %v683_v16  ;;  %687 = vst [vmem:[#allocation2 + $0x1c] sm:$0x1] %v686_v17  ;;  %v671_v22 = vsel %vm3814_vm13, %v593_v11, %v670_v56  ;;  %v674_v23 = vsel %vm3626_vm5, %v594_v12, %v673_v63  ;;  %v601_v24 = vor.u32 %v599_v1, %v598_v14  ;;  %v602_v25 = vrot.slane %v598_v14, 4 }
 0x107   : > { %672 = vst [vmem:[#allocation2 + $0x8] sm:$0xf] %v671_v22  ;;  %675 = vst [vmem:[#allocation2 + $0xc] sm:$0x1] %v674_v23  ;;  %v689_v26 = vsel %vm3814_vm13, %v617_v18, %v688_v8  ;;  %v692_v27 = vsel %vm3626_vm5, %v618_v19, %v691_v13  ;;  %v3009_v28 = vpack.c.bf16 %v489_v9, %v489_v9  ;;  %v712_v1 = vld [vmem:[#allocation2 + $0x40] sm:$0xf] }
 0x108   : > { %v3007_v30 = vpack.c.bf16 %v487_v15, %v487_v15  ;;  %690 = vst [vmem:[#allocation2 + $0x20] sm:$0xf] %v689_v26  ;;  %693 = vst [vmem:[#allocation2 + $0x24] sm:$0x1] %v692_v27  ;;  %v677_v31 = vsel %vm3814_vm13, %v601_v24, %v676_v20  ;;  %v680_v32 = vsel %vm3626_vm5, %v602_v25, %v679_v21  ;;  %v700_v18 = vld [vmem:[#allocation2 + $0x30] sm:$0xf] }
 0x109   : > { %v480_v33 = vadd.f32 %v3241_v3, %v3805_v29  ;;  %v472_v34 = vadd.f32 %v3805_v29, %v471_v10  ;;  %678 = vst [vmem:[#allocation2 + $0x10] sm:$0xf] %v677_v31  ;;  %681 = vst [vmem:[#allocation2 + $0x14] sm:$0x1] %v680_v32  ;;  %v636_v35 = vshrl.u32 %v3009_v28, 16  ;;  %v639_v36 = vshll.u32 %v3009_v28, 16 }
 0x10a   : > { %v620_v37 = vshrl.u32 %v3007_v30, 16  ;;  %v623_v38 = vshll.u32 %v3007_v30, 16  ;;  %v703_v19 = vld [vmem:[#allocation2 + $0x34] sm:$0x1] }
 0x10b   : > { %v490_v39 = vmax.f32 %v480_v33, 0.0  ;;  %v488_v40 = vmax.f32 %v472_v34, 0.0  ;;  %v638_v41 = vrot.slane %v636_v35, 7 }
 0x10c   : > { %v622_v43 = vrot.slane %v620_v37, 7 }
 0x10d   : > { %v3010_v47 = vpack.c.bf16 %v490_v39, %v490_v39  ;;  %v641_v48 = vor.u32 %v639_v36, %v638_v41  ;;  %v642_v52 = vrot.slane %v638_v41, 4  ;;  %v3008_v54 = vpack.c.bf16 %v488_v40, %v488_v40  ;;  %v1006_v26 = vld [vmem:[#allocation2 + $0x18] sm:$0xf]  ;;  %v928_v30 = vld [vmem:[#allocation2 + $0x1c] sm:$0x1] }
 0x10e   : > { %v625_v50 = vor.u32 %v623_v38, %v622_v43  ;;  %v626_v53 = vrot.slane %v622_v43, 4  ;;  %v923_v8 = vld [vmem:[#allocation2 + $0x8] sm:$0xe]  ;;  %v924_v9 = vld [vmem:[#allocation2 + $0xc] sm:$0x1]  ;;  %v970_v43 = vrot.slane %v928_v30, 5 }
 0x10f   : > { %v644_v29 = vshrl.u32 %v3010_v47, 16  ;;  %v707_v55 = vsel %vm3814_vm13, %v641_v48, %v706_v45  ;;  %v1409_v57 = vld [vmem:[#allocation2 + $0x20] sm:$0xe]  ;;  %v1410_v58 = vld [vmem:[#allocation2 + $0x24] sm:$0x1]  ;;  %v710_v59 = vsel %vm3626_vm5, %v642_v52, %v709_v49  ;;  %v647_v62 = vshll.u32 %v3010_v47, 16 }
 0x110   : > { %v695_v56 = vsel %vm3814_vm13, %v625_v50, %v694_v46  ;;  %708 = vst [vmem:[#allocation2 + $0x38] sm:$0xf] %v707_v55  ;;  %v698_v60 = vsel %vm3626_vm5, %v626_v53, %v697_v51  ;;  %v2877_v63 = vrot.slane %v1409_v57, 9  ;;  %v1447_v0 = vrot.slane %v1410_v58, 5  ;;  %711 = vst [vmem:[#allocation2 + $0x3c] sm:$0x1] %v710_v59 }
 0x111   : > { %696 = vst [vmem:[#allocation2 + $0x28] sm:$0xf] %v695_v56  ;;  %699 = vst [vmem:[#allocation2 + $0x2c] sm:$0x1] %v698_v60  ;;  %v3845_v3 = vld [vmem:[#allocation2 + $0x10] sm:$0xf] }
 0x112   : > { %v646_v5 = vrot.slane %v644_v29, 7  ;;  %v628_v6 = vshrl.u32 %v3008_v54, 16  ;;  %v631_v7 = vshll.u32 %v3008_v54, 16  ;;  %v2860_v10 = vrot.slane %v923_v8, 9  ;;  %v1004_v11 = vld [vmem:[#allocation2 + $0x8] sm:$0xf] }
 0x113   : > { %v1448_v12 = vsel %vm3730_vm9, %v2877_v63, %v1447_v0  ;;  %v962_v16 = vrot.slane %v924_v9, 5  ;;  %v1005_v17 = vld [vmem:[#allocation2 + $0x10] sm:$0xf]  ;;  %1012 = vst.msk [vmem:[#allocation3 + $0xc] sm:$0xf] %vm491_vm4, %v1004_v11  ;;  %v822_v31 = vshrl.u32 %v3845_v3, 16 }
 0x114   : > { %v649_v13 = vor.u32 %v647_v62, %v646_v5  ;;  %v650_v14 = vrot.slane %v646_v5, 4  ;;  %v630_v15 = vrot.slane %v628_v6, 7  ;;  %1479 = vst.msk [vmem:[#allocation3 + $0x68] sm:$0xf] %vm491_vm4, %v1448_v12  ;;  %1013 = vst.msk [vmem:[#allocation3 + $0x30] sm:$0xf] %vm491_vm4, %v1005_v17 }
 0x115   : > { %v925_v20 = vld [vmem:[#allocation2 + $0x10] sm:$0xe]  ;;  %v926_v25 = vld [vmem:[#allocation2 + $0x14] sm:$0x1]  ;;  %v963_v27 = vsel %vm3730_vm9, %v2860_v10, %v962_v16  ;;  %v927_v28 = vld [vmem:[#allocation2 + $0x18] sm:$0xe] }
 0x116   : > { %v713_v21 = vsel %vm3814_vm13, %v649_v13, %v712_v1  ;;  %v716_v22 = vsel %vm3626_vm5, %v650_v14, %v715_v2  ;;  %v633_v23 = vor.u32 %v631_v7, %v630_v15  ;;  %v634_v24 = vrot.slane %v630_v15, 4  ;;  %1014 = vst.msk [vmem:[#allocation3 + $0x54] sm:$0xf] %vm491_vm4, %v1006_v26  ;;  %997 = vst.msk [vmem:[#allocation3 + $0x2c] sm:$0xf] %vm491_vm4, %v963_v27  ;;  %v3357_v29 = vld [vmem:[%s4264_s2 + $0x180] sm:$0xff]  }
 0x117   : > { %714 = vst [vmem:[#allocation2 + $0x40] sm:$0xf] %v713_v21  ;;  %717 = vst [vmem:[#allocation2 + $0x44] sm:$0x1] %v716_v22  ;;  %v825_v34 = vshll.u32 %v3845_v3, 16  ;;  %v2861_v37 = vrot.slane %v925_v20, 9 }
 0x118   : > { %v701_v32 = vsel %vm3814_vm13, %v633_v23, %v700_v18  ;;  %v704_v33 = vsel %vm3626_vm5, %v634_v24, %v703_v19  ;;  %v1411_v35 = vld [vmem:[#allocation2 + $0x28] sm:$0xe]  ;;  %v1412_v36 = vld [vmem:[#allocation2 + $0x2c] sm:$0x1]  ;;  %v966_v38 = vrot.slane %v926_v25, 5  ;;  %v2862_v41 = vrot.slane %v927_v28, 9 }
 0x119   : > { %702 = vst [vmem:[#allocation2 + $0x30] sm:$0xf] %v701_v32  ;;  %705 = vst [vmem:[#allocation2 + $0x34] sm:$0x1] %v704_v33  ;;  %v2878_v39 = vrot.slane %v1411_v35, 9  ;;  %v1451_v40 = vrot.slane %v1412_v36, 5 }
 0x11a   : > { %v1007_v45 = vld [vmem:[#allocation2 + $0x20] sm:$0xf]  ;;  %v967_v61 = vsel %vm3730_vm9, %v2861_v37, %v966_v38  ;;  %v759_v44 = vld [vmem:[#allocation2 + $0x8] sm:$0xf]  ;;  %v824_v47 = vrot.slane %v822_v31, 4  ;;  %v971_v48 = vsel %vm3730_vm9, %v2862_v41, %v970_v43  ;;  %v827_v56 = vrot.slane %v825_v34, 5 }
 0x11b   : > { %1015 = vst.msk [vmem:[#allocation3 + $0x78] sm:$0xf] %vm491_vm4, %v1007_v45  ;;  %v776_v46 = vld [vmem:[#allocation2 + $0x8] sm:$0xf]  ;;  %998 = vst.msk [vmem:[#allocation3 + $0x50] sm:$0xf] %vm491_vm4, %v967_v61  ;;  %v1452_v53 = vsel %vm3730_vm9, %v2878_v39, %v1451_v40 }
 0x11c   : > { %767 = vst.msk [vmem:[#allocation3 + $0x24] sm:$0xf] %vm491_vm4, %v759_v44  ;;  %v777_v49 = vld [vmem:[#allocation2 + $0xc] sm:$0x1]  ;;  %v808_v50 = vshrl.u32 %v776_v46, 16  ;;  %v811_v51 = vshll.u32 %v776_v46, 16  ;;  %v828_v0 = vor.u32 %v827_v56, %v824_v47 }
 0x11d   : > { %v760_v52 = vld [vmem:[#allocation2 + $0x10] sm:$0xf]  ;;  %999 = vst.msk [vmem:[#allocation3 + $0x74] sm:$0xf] %vm491_vm4, %v971_v48  ;;  %v817_v54 = vshll.u32 %v777_v49, 16  ;;  %v3359_v1 = vld [vmem:[%s4264_s2 + $0x1c8] sm:$0xff]  }
 0x11e   : > { %v761_v55 = vld [vmem:[#allocation2 + $0x18] sm:$0xf]  ;;  %768 = vst.msk [vmem:[#allocation3 + $0x48] sm:$0xf] %vm491_vm4, %v760_v52  ;;  %1480 = vst.msk [vmem:[#allocation3 + $0x8c] sm:$0xf] %vm491_vm4, %v1452_v53 }
 0x11f   : > { %v780_v57 = vld [vmem:[#allocation2 + $0x18] sm:$0xf]  ;;  %v810_v58 = vrot.slane %v808_v50, 4  ;;  %v813_v59 = vrot.slane %v811_v51, 5  ;;  %769 = vst.msk [vmem:[#allocation3 + $0x6c] sm:$0xf] %vm491_vm4, %v761_v55 }
 0x120   : > { %v779_v60 = vld [vmem:[#allocation2 + $0x14] sm:$0x1]  ;;  %v3350_v62 = vld [vmem:[#allocation3 + $0x8] ss:$36 sps:$4 sm:$0xff]   ;;  %v819_v3 = vrot.slane %v817_v54, 5  ;;  %v3364_v6 = vld [vmem:[%s4264_s2 + $0x188] sm:$0xff]  }
 0x121   : > { %v3352_v63 = vld [vmem:[#allocation3 + $0xc] ss:$36 sps:$4 sm:$0xff]   ;;  %v814_v2 = vor.u32 %v813_v59, %v810_v58  ;;  %v829_v8 = vrot.slane %v828_v0, 4  ;;  %v831_v9 = vshll.u32 %v779_v60, 16  ;;  %v836_v10 = vshrl.u32 %v780_v57, 16  ;;  %v3368_v14 = vld [vmem:[%s4264_s2 + $0x1d0] sm:$0xff]  }
 0x122   : > { %v3885_v5 = vld [vmem:[#allocation2 + $0x20] sm:$0xf]  ;;  %2389 = vmatprep.mubr.bf16.mxu0 %v3352_v63  ;;  %v781_v7 = vld [vmem:[#allocation2 + $0x1c] sm:$0x1]  ;;  %v839_v11 = vshll.u32 %v780_v57, 16  ;;  %v3372_v34 = vld [vmem:[%s4264_s2 + $0x190] sm:$0xff]  }
 0x123   : > { %2390 = vmatmul.mubr.bf16.vlgmr.msra.gmra.mrb[8].mxu0 %v3350_v62  ;;  %v815_v12 = vrot.slane %v814_v2, 4  ;;  %v845_v13 = vshll.u32 %v781_v7, 16  ;;  %v929_v15 = vld [vmem:[#allocation2 + $0x20] sm:$0xe]  ;;  %v930_v16 = vld [vmem:[#allocation2 + $0x24] sm:$0x1] }
 0x124   : > { %v1496_v17 = vld [vmem:[#allocation3 + $0x50] sm:$0xff]  ;;  %3176 = vmatpush3.bf16.msra.mxu0 %v3357_v29  ;;  %v833_v18 = vrot.slane %v831_v9, 5  ;;  %v838_v19 = vrot.slane %v836_v10, 4  ;;  %v841_v20 = vrot.slane %v839_v11, 5  ;;  %v931_v21 = vld [vmem:[#allocation2 + $0x28] sm:$0xe] }
 0x125   : > { %v784_v22 = vld [vmem:[#allocation2 + $0x28] sm:$0xf]  ;;  %3177 = vmatprep.subr.bf16.mxu0 %v3359_v1  ;;  %v820_v25 = vsel %vm3779_vm12, %v815_v12, %v819_v3  ;;  %v932_v26 = vld [vmem:[#allocation2 + $0x2c] sm:$0x1]  ;;  %v847_v30 = vrot.slane %v845_v13, 5  ;;  %v2863_v31 = vrot.slane %v929_v15, 9 }
 0x126   : > { %v1501_v23 = vld [vmem:[#allocation3 + $0x74] sm:$0xff]  ;;  %914 = vst.msk [vmem:[#allocation3 + $0x28] sm:$0xf] %vm491_vm4, %v820_v25  ;;  %v834_v27 = vsel %vm3779_vm12, %v829_v8, %v833_v18  ;;  %v842_v28 = vor.u32 %v841_v20, %v838_v19  ;;  %v1009_v33 = vld [vmem:[#allocation2 + $0x30] sm:$0xf]  ;;  %v974_v35 = vrot.slane %v930_v16, 5 }
 0x127   : > { %v3355_v24 = vld [vmem:[#allocation3 + $0x54] ss:$36 sps:$4 sm:$0xff]   ;;  %915 = vst.msk [vmem:[#allocation3 + $0x4c] sm:$0xf] %vm491_vm4, %v834_v27  ;;  %v2864_v36 = vrot.slane %v931_v21, 9  ;;  %v978_v37 = vrot.slane %v932_v26, 5  ;;  %v2895_v43 = vcombine.low %v1496_v17, %v1501_v23 }
 0x128   : > { %v1008_v32 = vld [vmem:[#allocation2 + $0x28] sm:$0xf]  ;;  %2397 = vmatprep.mubr.bf16.mxu0 %v3355_v24  ;;  %1017 = vst.msk [vmem:[#allocation3 + $0xc0] sm:$0xf] %vm491_vm4, %v1009_v33  ;;  %v3374_v38 = vld [vmem:[%s4264_s2 + $0x1d8] sm:$0xff]   ;;  %v850_v40 = vshrl.u32 %v3885_v5, 16  ;;  %3178 = vmatpush3.bf16.msra.mxu0 %v3364_v6  ;;  %v975_v46 = vsel %vm3730_vm9, %v2863_v31, %v974_v35 }
 0x129   : > { %1016 = vst.msk [vmem:[#allocation3 + $0x9c] sm:$0xf] %vm491_vm4, %v1008_v32  ;;  %v762_v39 = vld [vmem:[#allocation2 + $0x20] sm:$0xf]  ;;  %v843_v41 = vrot.slane %v842_v28, 4  ;;  %v853_v44 = vshll.u32 %v3885_v5, 16  ;;  %3179 = vmatprep.subr.bf16.mxu0 %v3368_v14  ;;  %v979_v47 = vsel %vm3730_vm9, %v2864_v36, %v978_v37 }
 0x12a   : > { %v763_v45 = vld [vmem:[#allocation2 + $0x28] sm:$0xf]  ;;  %770 = vst.msk [vmem:[#allocation3 + $0x90] sm:$0xf] %vm491_vm4, %v762_v39  ;;  %v783_v61 = vld [vmem:[#allocation2 + $0x24] sm:$0x1] }
 0x12b   : > { %771 = vst.msk [vmem:[#allocation3 + $0xb4] sm:$0xf] %vm491_vm4, %v763_v45  ;;  %v785_v48 = vld [vmem:[#allocation2 + $0x2c] sm:$0x1]  ;;  %v852_v49 = vrot.slane %v850_v40, 4  ;;  %v859_v50 = vshll.u32 %v783_v61, 16  ;;  %v848_v53 = vsel %vm3779_vm12, %v843_v41, %v847_v30  ;;  %2398 = vmatmul.mubr.bf16.gmra.mrb[12].mxu0 %v2895_v43 }
 0x12c   : > { %v933_v51 = vld [vmem:[#allocation2 + $0x30] sm:$0xe]  ;;  %1000 = vst.msk [vmem:[#allocation3 + $0x98] sm:$0xf] %vm491_vm4, %v975_v46  ;;  %1001 = vst.msk [vmem:[#allocation3 + $0xbc] sm:$0xf] %vm491_vm4, %v979_v47  ;;  %3180 = vmatpush3.bf16.msra.mxu0 %v3372_v34 }
 0x12d   : > { %v3915_v52 = vld [vmem:[#allocation2 + $0x30] sm:$0xf]  ;;  %v3376_v29 = vld [vmem:[%s4264_s2 + $0x198] sm:$0xff]   ;;  %v855_v54 = vrot.slane %v853_v44, 5  ;;  %v864_v55 = vshrl.u32 %v784_v22, 16  ;;  %v867_v56 = vshll.u32 %v784_v22, 16  ;;  %3181 = vmatprep.subr.bf16.mxu0 %v3374_v38 }
 0x12e   : > { %v934_v57 = vld [vmem:[#allocation2 + $0x34] sm:$0x1]  ;;  %v3365_v58 = vld [vmem:[%s4264_s2 + $0x100] sm:$0xff]   ;;  %916 = vst.msk [vmem:[#allocation3 + $0x70] sm:$0xf] %vm491_vm4, %v848_v53  ;;  %v861_v59 = vrot.slane %v859_v50, 5 }
 0x12f   : > { %v873_v60 = vshll.u32 %v785_v48, 16  ;;  %v935_v62 = vld [vmem:[#allocation2 + $0x38] sm:$0xe]  ;;  %v936_v63 = vld [vmem:[#allocation2 + $0x3c] sm:$0x1]  ;;  %v856_v0 = vor.u32 %v855_v54, %v852_v49  ;;  %v866_v1 = vrot.slane %v864_v55, 4 }
 0x130   : > { %v869_v2 = vrot.slane %v867_v56, 5  ;;  %v3380_v3 = vld [vmem:[%s4264_s2 + $0x1e0] sm:$0xff]   ;;  %v2865_v5 = vrot.slane %v933_v51, 9  ;;  %v1010_v6 = vld [vmem:[#allocation2 + $0x38] sm:$0xf]  ;;  %v3371_v11 = vld [vmem:[%s4264_s2 + $0x148] sm:$0xff]   ;;  %3182 = vmatpush3.bf16.msra.mxu0 %v3376_v29 }
 0x131   : > { %v3931_v7 = vld [vmem:[#allocation2 + $0x38] sm:$0xf]  ;;  %v3360_v8 = vld [vmem:[#allocation3] ss:$36 sps:$4 sm:$0xff]   ;;  %v875_v10 = vrot.slane %v873_v60, 5  ;;  %v857_v12 = vrot.slane %v856_v0, 4  ;;  %3183 = vmatprep.subr.bf16.mxu0 %v3380_v3 }
 0x132   : > { %v3362_v9 = vld [vmem:[#allocation3 + $0x4] ss:$36 sps:$4 sm:$0xff]   ;;  %1018 = vst.msk [vmem:[#allocation3 + $0xe4] sm:$0xf] %vm491_vm4, %v1010_v6  ;;  %v870_v13 = vor.u32 %v869_v2, %v866_v1  ;;  %v982_v14 = vrot.slane %v934_v57, 5  ;;  %v2866_v15 = vrot.slane %v935_v62, 9 }
 0x133   : > { %v1011_v16 = vld [vmem:[#allocation2 + $0x40] sm:$0xf]  ;;  %v3937_v17 = vld [vmem:[#allocation2 + $0x10] sm:$0xf]  ;;  %2324 = vmatprep.mubr.bf16.mxu1 %v3362_v9  ;;  %v3939_v18 = vld [vmem:[#allocation3 + $0x48] sm:$0xff]  ;;  %v986_v20 = vrot.slane %v936_v63, 5  ;;  %v862_v26 = vsel %vm3779_vm12, %v857_v12, %v861_v59 }
 0x134   : > { %v3373_v19 = vld [vmem:[%s4264_s2 + $0x108] sm:$0xff]   ;;  %1019 = vst.msk [vmem:[#allocation3 + $0x108] sm:$0xf] %vm491_vm4, %v1011_v16  ;;  %v3384_v21 = vld [vmem:[%s4264_s2 + $0x1a0] sm:$0xff]   ;;  %v764_v22 = vld [vmem:[#allocation2 + $0x30] sm:$0xf]  ;;  %2325 = vmatmul.mubr.bf16.vlgmr.msra.gmra.mrb[0].mxu1 %v3360_v8  ;;  %v983_v28 = vsel %vm3730_vm9, %v2865_v5, %v982_v14 }
 0x135   : > { %v765_v23 = vld [vmem:[#allocation2 + $0x38] sm:$0xf]  ;;  %v878_v24 = vshrl.u32 %v3915_v52, 16  ;;  %v3375_v25 = vld [vmem:[%s4264_s2 + $0x150] sm:$0xff]   ;;  %v871_v27 = vrot.slane %v870_v13, 4  ;;  %v3386_v30 = vld [vmem:[%s4264_s2 + $0x1e8] sm:$0xff]   ;;  %3136 = vmatpush3.bf16.msra.mxu1 %v3365_v58  ;;  %v987_v37 = vsel %vm3730_vm9, %v2866_v15, %v986_v20  ;;  %3184 = vmatpush3.bf16.msra.mxu0 %v3384_v21 }
 0x136   : > { %772 = vst.msk [vmem:[#allocation3 + $0xd8] sm:$0xf] %vm491_vm4, %v764_v22  ;;  %773 = vst.msk [vmem:[#allocation3 + $0xfc] sm:$0xf] %vm491_vm4, %v765_v23  ;;  %v787_v31 = vld [vmem:[#allocation2 + $0x34] sm:$0x1]  ;;  %3137 = vmatprep.subr.bf16.mxu1 %v3371_v11  ;;  %3185 = vmatprep.subr.bf16.mxu0 %v3386_v30 }
 0x137   : > { %v789_v32 = vld [vmem:[#allocation2 + $0x3c] sm:$0x1]  ;;  %v881_v33 = vshll.u32 %v3915_v52, 16  ;;  %v1506_v34 = vld [vmem:[#allocation3 + $0x98] sm:$0xff]  ;;  %917 = vst.msk [vmem:[#allocation3 + $0x94] sm:$0xf] %vm491_vm4, %v862_v26  ;;  %v876_v43 = vsel %vm3779_vm12, %v871_v27, %v875_v10 }
 0x138   : > { %v1511_v35 = vld [vmem:[#allocation3 + $0xbc] sm:$0xff]  ;;  %1002 = vst.msk [vmem:[#allocation3 + $0xe0] sm:$0xf] %vm491_vm4, %v983_v28  ;;  %v880_v38 = vrot.slane %v878_v24, 4  ;;  %v887_v39 = vshll.u32 %v787_v31, 16  ;;  %v892_v44 = vshrl.u32 %v3931_v7, 16 }
 0x139   : > { %v3369_v36 = vld [vmem:[#allocation3 + $0x9c] ss:$36 sps:$4 sm:$0xff]   ;;  %v1263_v40 = vld [vmem:[#allocation2 + $0x18] sm:$0xf]  ;;  %v3366_v41 = vld [vmem:[#allocation3 + $0x4c] ss:$36 sps:$4 sm:$0xff]   ;;  %v2904_v45 = vcombine.low %v1506_v34, %v1511_v35  ;;  %3138 = vmatpush3.bf16.msra.mxu1 %v3373_v19 }
 0x13a   : > { %1003 = vst.msk [vmem:[#allocation3 + $0x104] sm:$0xf] %vm491_vm4, %v987_v37  ;;  %v883_v61 = vrot.slane %v881_v33, 5  ;;  %v3970_v46 = vld [vmem:[#allocation2 + $0x8] sm:$0xf]  ;;  %v1500_v47 = vld [vmem:[#allocation3 + $0x6c] sm:$0xff]  ;;  %2405 = vmatprep.mubr.bf16.mxu0 %v3369_v36  ;;  %2332 = vmatprep.mubr.bf16.mxu1 %v3366_v41 }
 0x13b   : > { %v3377_v48 = vld [vmem:[%s4264_s2 + $0x110] sm:$0xff]   ;;  %918 = vst.msk [vmem:[#allocation3 + $0xb8] sm:$0xf] %vm491_vm4, %v876_v43  ;;  %v3388_v49 = vld [vmem:[%s4264_s2 + $0x1a8] sm:$0xff]   ;;  %v889_v50 = vrot.slane %v887_v39, 5  ;;  %v895_v51 = vshll.u32 %v3931_v7, 16  ;;  %v2893_v29 = vcombine.low %v3939_v18, %v1500_v47  ;;  %2406 = vmatmul.mubr.bf16.gmra.mrb[16].mxu0 %v2904_v45  ;;  %3139 = vmatprep.subr.bf16.mxu1 %v3375_v25 }
 0x13c   : > { %v901_v52 = vshll.u32 %v789_v32, 16  ;;  %v1245_v53 = vld [vmem:[#allocation2 + $0x10] sm:$0xf]  ;;  %v884_v54 = vor.u32 %v883_v61, %v880_v38  ;;  %v894_v55 = vrot.slane %v892_v44, 4  ;;  %v1246_v56 = vld [vmem:[#allocation2 + $0x18] sm:$0xf]  ;;  %3186 = vmatpush3.bf16.msra.mxu0 %v3388_v49 }
 0x13d   : > { %1253 = vst.msk [vmem:[#allocation3 + $0x18] sm:$0xf] %vm491_vm4, %v1245_v53  ;;  %v1262_v57 = vld [vmem:[#allocation2 + $0x14] sm:$0x1]  ;;  %v1278_v58 = vshrl.u32 %v3937_v17, 16  ;;  %v897_v59 = vrot.slane %v895_v51, 5  ;;  %2333 = vmatmul.mubr.bf16.gmra.mrb[4].mxu1 %v2893_v29 }
 0x13e   : > { %v903_v60 = vrot.slane %v901_v52, 5  ;;  %1254 = vst.msk [vmem:[#allocation3 + $0x3c] sm:$0xf] %vm491_vm4, %v1246_v56  ;;  %v1264_v62 = vld [vmem:[#allocation2 + $0x1c] sm:$0x1]  ;;  %v1281_v63 = vshll.u32 %v3937_v17, 16  ;;  %3140 = vmatpush3.bf16.msra.mxu1 %v3377_v48 }
 0x13f   : > { %v1287_v0 = vshll.u32 %v1262_v57, 16  ;;  %v3383_v1 = vld [vmem:[%s4264_s2 + $0x158] sm:$0xff]   ;;  %v885_v2 = vrot.slane %v884_v54, 4  ;;  %v3392_v3 = vld [vmem:[%s4264_s2 + $0x1f0] sm:$0xff]   ;;  %v1280_v5 = vrot.slane %v1278_v58, 4  ;;  %v1292_v6 = vshrl.u32 %v1263_v40, 16 }
 0x140   : > { %v1295_v7 = vshll.u32 %v1263_v40, 16  ;;  %v3991_v8 = vld [vmem:[#allocation2 + $0x10] sm:$0xf]  ;;  %v3385_v9 = vld [vmem:[%s4264_s2 + $0x118] sm:$0xff]   ;;  %v898_v10 = vor.u32 %v897_v59, %v894_v55  ;;  %v1283_v12 = vrot.slane %v1281_v63, 5  ;;  %v1301_v14 = vshll.u32 %v1264_v62, 16  ;;  %3141 = vmatprep.subr.bf16.mxu1 %v3383_v1  ;;  %3187 = vmatprep.subr.bf16.mxu0 %v3392_v3 }
 0x141   : > { %v3394_v11 = vld [vmem:[%s4264_s2 + $0x1b0] sm:$0xff]   ;;  %v1289_v13 = vrot.slane %v1287_v0, 5  ;;  %v1021_v15 = vld [vmem:[#allocation2 + $0xc] sm:$0x1]  ;;  %v3387_v17 = vld [vmem:[%s4264_s2 + $0x160] sm:$0xff]   ;;  %v890_v18 = vsel %vm3779_vm12, %v885_v2, %v889_v50  ;;  %v1294_v19 = vrot.slane %v1292_v6, 4 }
 0x142   : > { %v1516_v16 = vld [vmem:[#allocation3 + $0xe0] sm:$0xff]  ;;  %v1297_v20 = vrot.slane %v1295_v7, 5  ;;  %v3399_v21 = vld [vmem:[%s4264_s2 + $0x1f8] sm:$0xff]   ;;  %v1037_v23 = vshrl.u32 %v3970_v46, 16  ;;  %v899_v26 = vrot.slane %v898_v10, 4  ;;  %v1284_v27 = vor.u32 %v1283_v12, %v1280_v5  ;;  %v1505_v31 = vld [vmem:[#allocation3 + $0x90] sm:$0xff]  ;;  %3142 = vmatpush3.bf16.msra.mxu1 %v3385_v9  ;;  %3188 = vmatpush3.bf16.msra.mxu0 %v3394_v11 }
 0x143   : > { %v1023_v22 = vld [vmem:[#allocation2 + $0x14] sm:$0x1]  ;;  %919 = vst.msk [vmem:[#allocation3 + $0xdc] sm:$0xf] %vm491_vm4, %v890_v18  ;;  %v1303_v28 = vrot.slane %v1301_v14, 5  ;;  %v1040_v30 = vshll.u32 %v3970_v46, 16  ;;  %3143 = vmatprep.subr.bf16.mxu1 %v3387_v17  ;;  %3189 = vmatprep.subr.bf16.mxu0 %v3399_v21 }
 0x144   : > { %v1521_v24 = vld [vmem:[#allocation3 + $0x104] sm:$0xff]  ;;  %v1510_v32 = vld [vmem:[#allocation3 + $0xb4] sm:$0xff]  ;;  %v1298_v35 = vor.u32 %v1297_v20, %v1294_v19  ;;  %v1039_v36 = vrot.slane %v1037_v23, 4  ;;  %v1046_v37 = vshll.u32 %v1021_v15, 16  ;;  %v4010_v38 = vld [vmem:[#allocation2 + $0x20] sm:$0xf]  ;;  %v904_v41 = vsel %vm3779_vm12, %v899_v26, %v903_v60 }
 0x145   : > { %v3381_v25 = vld [vmem:[#allocation3 + $0xe4] ss:$36 sps:$4 sm:$0xff]   ;;  %v3378_v33 = vld [vmem:[#allocation3 + $0x94] ss:$36 sps:$4 sm:$0xff]   ;;  %v2913_v34 = vcombine.low %v1516_v16, %v1521_v24  ;;  %v2902_v39 = vcombine.low %v1505_v31, %v1510_v32  ;;  %v1285_v43 = vrot.slane %v1284_v27, 4  ;;  %v1042_v61 = vrot.slane %v1040_v30, 5 }
 0x146   : > { %2413 = vmatprep.mubr.bf16.mxu0 %v3381_v25  ;;  %v3389_v40 = vld [vmem:[%s4264_s2 + $0x120] sm:$0xff]   ;;  %v3401_v45 = vld [vmem:[%s4264_s2 + $0x1b8] sm:$0xff]   ;;  %v1164_v44 = vld [vmem:[#allocation2 + $0x8] sm:$0xe]  ;;  %2340 = vmatprep.mubr.bf16.mxu1 %v3378_v33  ;;  %920 = vst.msk [vmem:[#allocation3 + $0x100] sm:$0xf] %vm491_vm4, %v904_v41 }
 0x147   : > { %v1165_v46 = vld [vmem:[#allocation2 + $0xc] sm:$0x1]  ;;  %v4020_v47 = vld [vmem:[#allocation2 + $0x28] sm:$0xf]  ;;  %2414 = vmatmul.mubr.bf16.gmra.mrb[20].mxu0 %v2913_v34  ;;  %v1299_v48 = vrot.slane %v1298_v35, 4  ;;  %v1048_v49 = vrot.slane %v1046_v37, 5  ;;  %v1290_v53 = vsel %vm3779_vm12, %v1285_v43, %v1289_v13  ;;  %v1043_v29 = vor.u32 %v1042_v61, %v1039_v36  ;;  %2341 = vmatmul.mubr.bf16.gmra.mrb[8].mxu1 %v2902_v39 }
 0x148   : > { %v1051_v50 = vshrl.u32 %v3991_v8, 16  ;;  %v1054_v51 = vshll.u32 %v3991_v8, 16  ;;  %v1166_v52 = vld [vmem:[#allocation2 + $0x10] sm:$0xe]  ;;  %v1060_v54 = vshll.u32 %v1023_v22, 16  ;;  %v2867_v56 = vrot.slane %v1164_v44, 9  ;;  %3144 = vmatpush3.bf16.msra.mxu1 %v3389_v40  ;;  %3190 = vmatpush3.bf16.msra.mxu0 %v3401_v45 }
 0x149   : > { %v1167_v55 = vld [vmem:[#allocation2 + $0x14] sm:$0x1]  ;;  %v1247_v57 = vld [vmem:[#allocation2 + $0x20] sm:$0xf]  ;;  %v3393_v58 = vld [vmem:[%s4264_s2 + $0x168] sm:$0xff]   ;;  %v1304_v59 = vsel %vm3779_vm12, %v1299_v48, %v1303_v28  ;;  %v1198_v63 = vrot.slane %v1165_v46, 5 }
 0x14a   : > { %1397 = vst.msk [vmem:[#allocation3 + $0x1c] sm:$0xf] %vm491_vm4, %v1290_v53  ;;  %v1053_v60 = vrot.slane %v1051_v50, 4  ;;  %v1056_v62 = vrot.slane %v1054_v51, 5  ;;  %v1248_v0 = vld [vmem:[#allocation2 + $0x28] sm:$0xf]  ;;  %3145 = vmatprep.subr.bf16.mxu1 %v3393_v58 }
 0x14b   : > { %1255 = vst.msk [vmem:[#allocation3 + $0x60] sm:$0xf] %vm491_vm4, %v1247_v57  ;;  %1398 = vst.msk [vmem:[#allocation3 + $0x40] sm:$0xf] %vm491_vm4, %v1304_v59  ;;  %v1044_v1 = vrot.slane %v1043_v29, 4  ;;  %v1062_v2 = vrot.slane %v1060_v54, 5  ;;  %v1199_v9 = vsel %vm3730_vm9, %v2867_v56, %v1198_v63 }
 0x14c   : > { %v2868_v3 = vrot.slane %v1166_v52, 9  ;;  %v1202_v5 = vrot.slane %v1167_v55, 5  ;;  %1256 = vst.msk [vmem:[#allocation3 + $0x84] sm:$0xf] %vm491_vm4, %v1248_v0  ;;  %v1266_v6 = vld [vmem:[#allocation2 + $0x24] sm:$0x1]  ;;  %v1057_v8 = vor.u32 %v1056_v62, %v1053_v60 }
 0x14d   : > { %v3398_v7 = vld [vmem:[%s4264_s2 + $0x128] sm:$0xff]   ;;  %v1306_v11 = vshrl.u32 %v4010_v38, 16  ;;  %v1309_v12 = vshll.u32 %v4010_v38, 16  ;;  %v1024_v13 = vld [vmem:[#allocation2 + $0x18] sm:$0xf]  ;;  %v3400_v15 = vld [vmem:[%s4264_s2 + $0x170] sm:$0xff]   ;;  %v1049_v16 = vsel %vm3779_vm12, %v1044_v1, %v1048_v49 }
 0x14e   : > { %v1268_v10 = vld [vmem:[#allocation2 + $0x2c] sm:$0x1]  ;;  %v1203_v17 = vsel %vm3730_vm9, %v2868_v3, %v1202_v5  ;;  %1236 = vst.msk [vmem:[#allocation3 + $0x14] sm:$0xf] %vm491_vm4, %v1199_v9  ;;  %v1315_v18 = vshll.u32 %v1266_v6, 16  ;;  %v1320_v19 = vshrl.u32 %v4020_v47, 16  ;;  %3146 = vmatpush3.bf16.msra.mxu1 %v3398_v7 }
 0x14f   : > { %v1515_v14 = vld [vmem:[#allocation3 + $0xd8] sm:$0xff]  ;;  %v4052_v20 = vld [vmem:[#allocation2 + $0x20] sm:$0xf]  ;;  %v1058_v21 = vrot.slane %v1057_v8, 4  ;;  %1156 = vst.msk [vmem:[#allocation3 + $0x10] sm:$0xf] %vm491_vm4, %v1049_v16  ;;  %3147 = vmatprep.subr.bf16.mxu1 %v3400_v15 }
 0x150   : > { %1237 = vst.msk [vmem:[#allocation3 + $0x38] sm:$0xf] %vm491_vm4, %v1203_v17  ;;  %v1308_v22 = vrot.slane %v1306_v11, 4  ;;  %v1311_v23 = vrot.slane %v1309_v12, 5  ;;  %v1323_v24 = vshll.u32 %v4020_v47, 16  ;;  %v3402_v27 = vld [vmem:[%s4264_s2 + $0x130] sm:$0xff]  }
 0x151   : > { %v1025_v25 = vld [vmem:[#allocation2 + $0x1c] sm:$0x1]  ;;  %v3390_v26 = vld [vmem:[#allocation3 + $0xdc] ss:$36 sps:$4 sm:$0xff]   ;;  %v1322_v28 = vrot.slane %v1320_v19, 4  ;;  %v1329_v30 = vshll.u32 %v1268_v10, 16  ;;  %v1063_v32 = vsel %vm3779_vm12, %v1058_v21, %v1062_v2 }
 0x152   : > { %v1027_v31 = vld [vmem:[#allocation2 + $0x24] sm:$0x1]  ;;  %v3406_v33 = vld [vmem:[%s4264_s2 + $0x178] sm:$0xff]   ;;  %v1312_v34 = vor.u32 %v1311_v23, %v1308_v22  ;;  %v1317_v35 = vrot.slane %v1315_v18, 5  ;;  %v1325_v36 = vrot.slane %v1323_v24, 5  ;;  %v1520_v39 = vld [vmem:[#allocation3 + $0xfc] sm:$0xff]  ;;  %2348 = vmatprep.mubr.bf16.mxu1 %v3390_v26  ;;  %3148 = vmatpush3.bf16.msra.mxu1 %v3402_v27 }
 0x153   : > { %v1168_v37 = vld [vmem:[#allocation2 + $0x18] sm:$0xe]  ;;  %v1169_v38 = vld [vmem:[#allocation2 + $0x1c] sm:$0x1]  ;;  %1157 = vst.msk [vmem:[#allocation3 + $0x34] sm:$0xf] %vm491_vm4, %v1063_v32  ;;  %v2911_v48 = vcombine.low %v1515_v14, %v1520_v39  ;;  %3149 = vmatprep.subr.bf16.mxu1 %v3406_v33 }
 0x154   : > { %v1331_v40 = vrot.slane %v1329_v30, 5  ;;  %v1065_v41 = vshrl.u32 %v1024_v13, 16  ;;  %v1068_v43 = vshll.u32 %v1024_v13, 16  ;;  %v1074_v45 = vshll.u32 %v1025_v25, 16  ;;  %v1170_v61 = vld [vmem:[#allocation2 + $0x20] sm:$0xe] }
 0x155   : > { %v1269_v44 = vld [vmem:[#allocation2 + $0x30] sm:$0xf]  ;;  %v3395_v46 = vld [vmem:[#allocation3 + $0x18] ss:$36 sps:$4 sm:$0xff]   ;;  %v1313_v49 = vrot.slane %v1312_v34, 4  ;;  %v1326_v50 = vor.u32 %v1325_v36, %v1322_v28  ;;  %v1079_v29 = vshrl.u32 %v4052_v20, 16  ;;  %2349 = vmatmul.mubr.bf16.gmra.mrb[12].mxu1 %v2911_v48 }
 0x156   : > { %v3397_v47 = vld [vmem:[#allocation3 + $0x1c] ss:$36 sps:$4 sm:$0xff]   ;;  %v1067_v51 = vrot.slane %v1065_v41, 4  ;;  %v1070_v52 = vrot.slane %v1068_v43, 5  ;;  %v1076_v53 = vrot.slane %v1074_v45, 5  ;;  %v3409_v57 = vld [vmem:[%s4264_s2 + $0x138] sm:$0xff]  }
 0x157   : > { %v1171_v54 = vld [vmem:[#allocation2 + $0x24] sm:$0x1]  ;;  %2519 = vmatprep.mubr.bf16.mxu0 %v3397_v47  ;;  %v1318_v55 = vsel %vm3779_vm12, %v1313_v49, %v1317_v35  ;;  %v1327_v56 = vrot.slane %v1326_v50, 4  ;;  %v1082_v58 = vshll.u32 %v4052_v20, 16  ;;  %v1088_v59 = vshll.u32 %v1027_v31, 16  ;;  %v3415_v20 = vld [vmem:[%s4264_s2 + $0x208] sm:$0xff]   ;;  %3150 = vmatpush3.bf16.msra.mxu1 %v3409_v57 }
 0x158   : > { %v1249_v60 = vld [vmem:[#allocation2 + $0x30] sm:$0xf]  ;;  %v1271_v62 = vld [vmem:[#allocation2 + $0x38] sm:$0xf]  ;;  %2520 = vmatmul.mubr.bf16.vlgmr.msra.gmra.mrb[24].mxu0 %v3395_v46  ;;  %1399 = vst.msk [vmem:[#allocation3 + $0x64] sm:$0xf] %vm491_vm4, %v1318_v55  ;;  %v1071_v63 = vor.u32 %v1070_v52, %v1067_v51 }
 0x159   : > { %v1081_v0 = vrot.slane %v1079_v29, 4  ;;  %v2869_v1 = vrot.slane %v1168_v37, 9  ;;  %v1206_v2 = vrot.slane %v1169_v38, 5  ;;  %v1250_v3 = vld [vmem:[#allocation2 + $0x38] sm:$0xf]  ;;  %v1332_v5 = vsel %vm3779_vm12, %v1327_v56, %v1331_v40  ;;  %v3410_v6 = vld [vmem:[%s4264_s2 + $0x200] sm:$0xff]  }
 0x15a   : > { %1257 = vst.msk [vmem:[#allocation3 + $0xa8] sm:$0xf] %vm491_vm4, %v1249_v60  ;;  %v1084_v7 = vrot.slane %v1082_v58, 5  ;;  %v1090_v8 = vrot.slane %v1088_v59, 5  ;;  %v2870_v9 = vrot.slane %v1170_v61, 9  ;;  %v1072_v12 = vrot.slane %v1071_v63, 4  ;;  %3242 = vmatprep.subr.bf16.mxu1 %v3410_v6 }
 0x15b   : > { %1258 = vst.msk [vmem:[#allocation3 + $0xcc] sm:$0xf] %vm491_vm4, %v1250_v3  ;;  %v1270_v10 = vld [vmem:[#allocation2 + $0x34] sm:$0x1]  ;;  %v1028_v11 = vld [vmem:[#allocation2 + $0x28] sm:$0xf]  ;;  %v1207_v13 = vsel %vm3730_vm9, %v2869_v1, %v1206_v2 }
 0x15c   : > { %1400 = vst.msk [vmem:[#allocation3 + $0x88] sm:$0xf] %vm491_vm4, %v1332_v5  ;;  %v1210_v14 = vrot.slane %v1171_v54, 5  ;;  %v1334_v15 = vshrl.u32 %v1269_v44, 16  ;;  %v3405_v16 = vld [vmem:[#allocation3 + $0x14] ss:$36 sps:$4 sm:$0xff]   ;;  %v1085_v17 = vor.u32 %v1084_v7, %v1081_v0  ;;  %v1077_v23 = vsel %vm3779_vm12, %v1072_v12, %v1076_v53 }
 0x15d   : > { %1238 = vst.msk [vmem:[#allocation3 + $0x5c] sm:$0xf] %vm491_vm4, %v1207_v13  ;;  %v1272_v18 = vld [vmem:[#allocation2 + $0x3c] sm:$0x1]  ;;  %v1337_v19 = vshll.u32 %v1269_v44, 16  ;;  %v1343_v26 = vshll.u32 %v1270_v10, 16  ;;  %2454 = vmatprep.mubr.bf16.mxu1 %v3405_v16 }
 0x15e   : > { %v1030_v21 = vld [vmem:[#allocation2 + $0x30] sm:$0xf]  ;;  %v3403_v22 = vld [vmem:[#allocation3 + $0x10] ss:$36 sps:$4 sm:$0xff]   ;;  %v1211_v24 = vsel %vm3730_vm9, %v2870_v9, %v1210_v14  ;;  %v1336_v25 = vrot.slane %v1334_v15, 4  ;;  %v1086_v27 = vrot.slane %v1085_v17, 4 }
 0x15f   : > { %1158 = vst.msk [vmem:[#allocation3 + $0x58] sm:$0xf] %vm491_vm4, %v1077_v23  ;;  %1239 = vst.msk [vmem:[#allocation3 + $0x80] sm:$0xf] %vm491_vm4, %v1211_v24  ;;  %v1339_v28 = vrot.slane %v1337_v19, 5  ;;  %v1348_v30 = vshrl.u32 %v1271_v62, 16  ;;  %2455 = vmatmul.mubr.bf16.vlgmr.msra.gmra.mrb[16].mxu1 %v3403_v22 }
 0x160   : > { %v1351_v31 = vshll.u32 %v1271_v62, 16  ;;  %v1029_v32 = vld [vmem:[#allocation2 + $0x2c] sm:$0x1]  ;;  %v1345_v33 = vrot.slane %v1343_v26, 5  ;;  %v1357_v34 = vshll.u32 %v1272_v18, 16  ;;  %v1093_v36 = vshrl.u32 %v1028_v11, 16  ;;  %3243 = vmatpush3.bf16.msra.mxu1 %v3410_v6 }
 0x161   : > { %v1031_v35 = vld [vmem:[#allocation2 + $0x34] sm:$0x1]  ;;  %v1096_v37 = vshll.u32 %v1028_v11, 16  ;;  %v1091_v39 = vsel %vm3779_vm12, %v1086_v27, %v1090_v8  ;;  %v1340_v40 = vor.u32 %v1339_v28, %v1336_v25  ;;  %v1350_v41 = vrot.slane %v1348_v30, 4  ;;  %v1172_v61 = vld [vmem:[#allocation2 + $0x28] sm:$0xe]  ;;  %3244 = vmatprep.subr.bf16.mxu1 %v3415_v20 }
 0x162   : > { %v1498_v38 = vld [vmem:[#allocation3 + $0x60] sm:$0xff]  ;;  %v1353_v43 = vrot.slane %v1351_v31, 5  ;;  %v1173_v44 = vld [vmem:[#allocation2 + $0x2c] sm:$0x1]  ;;  %1159 = vst.msk [vmem:[#allocation3 + $0x7c] sm:$0xf] %vm491_vm4, %v1091_v39 }
 0x163   : > { %v4099_v45 = vld [vmem:[%s4264_s2 + $0x210] sm:$0xff]   ;;  %v1359_v46 = vrot.slane %v1357_v34, 5  ;;  %v1095_v47 = vrot.slane %v1093_v36, 4  ;;  %v1098_v48 = vrot.slane %v1096_v37, 5  ;;  %v1102_v49 = vshll.u32 %v1029_v32, 16  ;;  %v3421_v17 = vld [vmem:[%s4264_s2 + $0x218] sm:$0xff]  }
 0x164   : > { %v1174_v50 = vld [vmem:[#allocation2 + $0x30] sm:$0xe]  ;;  %v1503_v51 = vld [vmem:[#allocation3 + $0x84] sm:$0xff]  ;;  %v1341_v53 = vrot.slane %v1340_v40, 4  ;;  %v1354_v29 = vor.u32 %v1353_v43, %v1350_v41  ;;  %v1107_v54 = vshrl.u32 %v1030_v21, 16  ;;  %v1110_v55 = vshll.u32 %v1030_v21, 16  ;;  %3245 = vmatpush3.bf16.msra.mxu1 %v3415_v20 }
 0x165   : > { %v3407_v52 = vld [vmem:[#allocation3 + $0x64] ss:$36 sps:$4 sm:$0xff]   ;;  %v2899_v57 = vcombine.low %v1498_v38, %v1503_v51  ;;  %v1099_v58 = vor.u32 %v1098_v48, %v1095_v47  ;;  %v1104_v59 = vrot.slane %v1102_v49, 5  ;;  %v1116_v60 = vshll.u32 %v1031_v35, 16  ;;  %v1251_v63 = vld [vmem:[#allocation2 + $0x40] sm:$0xf]  ;;  %3246 = vmatprep.subr.bf16.mxu1 %v4099_v45 }
 0x166   : > { %v4102_v56 = vld [vmem:[#allocation2 + $0x38] sm:$0xf]  ;;  %v1175_v62 = vld [vmem:[#allocation2 + $0x34] sm:$0x1]  ;;  %v1273_v0 = vld [vmem:[#allocation2 + $0x40] sm:$0xf]  ;;  %2527 = vmatprep.mubr.bf16.mxu0 %v3407_v52  ;;  %v1346_v1 = vsel %vm3779_vm12, %v1341_v53, %v1345_v33 }
 0x167   : > { %v1355_v2 = vrot.slane %v1354_v29, 4  ;;  %v1109_v3 = vrot.slane %v1107_v54, 4  ;;  %v1112_v5 = vrot.slane %v1110_v55, 5  ;;  %1259 = vst.msk [vmem:[#allocation3 + $0xf0] sm:$0xf] %vm491_vm4, %v1251_v63  ;;  %2528 = vmatmul.mubr.bf16.gmra.mrb[28].mxu0 %v2899_v57  ;;  %v1100_v6 = vrot.slane %v1099_v58, 4 }
 0x168   : > { %1401 = vst.msk [vmem:[#allocation3 + $0xac] sm:$0xf] %vm491_vm4, %v1346_v1  ;;  %v1118_v7 = vrot.slane %v1116_v60, 5  ;;  %v2871_v8 = vrot.slane %v1172_v61, 9  ;;  %v1214_v9 = vrot.slane %v1173_v44, 5  ;;  %v1497_v12 = vld [vmem:[#allocation3 + $0x58] sm:$0xff]  ;;  %3247 = vmatpush3.bf16.msra.mxu1 %v4099_v45 }
 0x169   : > { %v1274_v10 = vld [vmem:[#allocation2 + $0x44] sm:$0x1]  ;;  %v1034_v11 = vld [vmem:[#allocation2 + $0x40] sm:$0xf]  ;;  %v1360_v13 = vsel %vm3779_vm12, %v1355_v2, %v1359_v46  ;;  %v1113_v14 = vor.u32 %v1112_v5, %v1109_v3  ;;  %v2872_v15 = vrot.slane %v1174_v50, 9  ;;  %v1218_v16 = vrot.slane %v1175_v62, 5  ;;  %3248 = vmatprep.subr.bf16.mxu1 %v3421_v17 }
 0x16a   : > { %v1033_v18 = vld [vmem:[#allocation2 + $0x3c] sm:$0x1]  ;;  %1402 = vst.msk [vmem:[#allocation3 + $0xd0] sm:$0xf] %vm491_vm4, %v1360_v13  ;;  %v1105_v19 = vsel %vm3779_vm12, %v1100_v6, %v1104_v59  ;;  %v1215_v20 = vsel %vm3730_vm9, %v2871_v8, %v1214_v9  ;;  %v1362_v21 = vshrl.u32 %v1273_v0, 16  ;;  %v1365_v22 = vshll.u32 %v1273_v0, 16 }
 0x16b   : > { %v1035_v23 = vld [vmem:[#allocation2 + $0x44] sm:$0x1]  ;;  %v1176_v24 = vld [vmem:[#allocation2 + $0x38] sm:$0xe]  ;;  %v1177_v25 = vld [vmem:[#allocation2 + $0x3c] sm:$0x1]  ;;  %v1219_v30 = vsel %vm3730_vm9, %v2872_v15, %v1218_v16 }
 0x16c   : > { %v1502_v26 = vld [vmem:[#allocation3 + $0x7c] sm:$0xff]  ;;  %v1114_v28 = vrot.slane %v1113_v14, 4  ;;  %1160 = vst.msk [vmem:[#allocation3 + $0xa0] sm:$0xf] %vm491_vm4, %v1105_v19  ;;  %1240 = vst.msk [vmem:[#allocation3 + $0xa4] sm:$0xf] %vm491_vm4, %v1215_v20  ;;  %3249 = vmatpush3.bf16.msra.mxu1 %v3421_v17 }
 0x16d   : > { %v3411_v27 = vld [vmem:[#allocation3 + $0x5c] ss:$36 sps:$4 sm:$0xff]   ;;  %v1371_v31 = vshll.u32 %v1274_v10, 16  ;;  %v1121_v32 = vshrl.u32 %v4102_v56, 16  ;;  %v2897_v33 = vcombine.low %v1497_v12, %v1502_v26  ;;  %1241 = vst.msk [vmem:[#allocation3 + $0xc8] sm:$0xf] %vm491_vm4, %v1219_v30 }
 0x16e   : > { %v1364_v34 = vrot.slane %v1362_v21, 4  ;;  %v1367_v35 = vrot.slane %v1365_v22, 5  ;;  %v1124_v36 = vshll.u32 %v4102_v56, 16  ;;  %v1178_v37 = vld [vmem:[#allocation2 + $0x40] sm:$0xe]  ;;  %2462 = vmatprep.mubr.bf16.mxu1 %v3411_v27  ;;  %v1119_v38 = vsel %vm3779_vm12, %v1114_v28, %v1118_v7  ;;  %v3425_v58 = vld [vmem:[%s4264_s2 + $0x228] sm:$0xff]  }
 0x16f   : > { %v1373_v39 = vrot.slane %v1371_v31, 5  ;;  %v3422_v40 = vld [vmem:[%s4264_s2 + $0x220] sm:$0xff]   ;;  %v1123_v41 = vrot.slane %v1121_v32, 4  ;;  %v1130_v43 = vshll.u32 %v1033_v18, 16  ;;  %2463 = vmatmul.mubr.bf16.gmra.mrb[20].mxu1 %v2897_v33  ;;  %1161 = vst.msk [vmem:[#allocation3 + $0xc4] sm:$0xf] %vm491_vm4, %v1119_v38 }
 0x170   : > { %v1179_v45 = vld [vmem:[#allocation2 + $0x44] sm:$0x1]  ;;  %v1368_v61 = vor.u32 %v1367_v35, %v1364_v34  ;;  %v1126_v44 = vrot.slane %v1124_v36, 5  ;;  %v1135_v46 = vshrl.u32 %v1034_v11, 16  ;;  %v1138_v47 = vshll.u32 %v1034_v11, 16  ;;  %v1508_v50 = vld [vmem:[#allocation3 + $0xa8] sm:$0xff]  ;;  %3250 = vmatprep.subr.bf16.mxu1 %v3422_v40 }
 0x171   : > { %v1405_v48 = vld [vmem:[#allocation2 + $0x10] sm:$0xe]  ;;  %v1406_v49 = vld [vmem:[#allocation2 + $0x14] sm:$0x1]  ;;  %v1132_v51 = vrot.slane %v1130_v43, 5  ;;  %v1144_v52 = vshll.u32 %v1035_v23, 16  ;;  %3251 = vmatpush3.bf16.msra.mxu1 %v3422_v40 }
 0x172   : > { %v2873_v53 = vrot.slane %v1176_v24, 9  ;;  %v1222_v29 = vrot.slane %v1177_v25, 5  ;;  %v1369_v54 = vrot.slane %v1368_v61, 4  ;;  %v1127_v55 = vor.u32 %v1126_v44, %v1123_v41  ;;  %v1407_v59 = vld [vmem:[#allocation2 + $0x18] sm:$0xe]  ;;  %v1513_v60 = vld [vmem:[#allocation3 + $0xcc] sm:$0xff]  ;;  %3252 = vmatprep.subr.bf16.mxu1 %v3425_v58 }
 0x173   : > { %v1137_v56 = vrot.slane %v1135_v46, 4  ;;  %v1140_v57 = vrot.slane %v1138_v47, 5  ;;  %v3413_v62 = vld [vmem:[#allocation3 + $0xac] ss:$36 sps:$4 sm:$0xff]   ;;  %v1146_v63 = vrot.slane %v1144_v52, 5  ;;  %v2874_v1 = vrot.slane %v1178_v37, 9 }
 0x174   : > { %v1223_v0 = vsel %vm3730_vm9, %v2873_v53, %v1222_v29  ;;  %v1226_v2 = vrot.slane %v1179_v45, 5  ;;  %v2908_v3 = vcombine.low %v1508_v50, %v1513_v60  ;;  %v1374_v5 = vsel %vm3779_vm12, %v1369_v54, %v1373_v39  ;;  %v1408_v8 = vld [vmem:[#allocation2 + $0x1c] sm:$0x1]  ;;  %2535 = vmatprep.mubr.bf16.mxu0 %v3413_v62  ;;  %v1507_v13 = vld [vmem:[#allocation3 + $0xa0] sm:$0xff]  ;;  %v1415_v27 = vld [vmem:[#allocation2 + $0x38] sm:$0xe] }
 0x175   : > { %v1128_v6 = vrot.slane %v1127_v55, 4  ;;  %v1141_v7 = vor.u32 %v1140_v57, %v1137_v56  ;;  %1242 = vst.msk [vmem:[#allocation3 + $0xec] sm:$0xf] %vm491_vm4, %v1223_v0  ;;  %1403 = vst.msk [vmem:[#allocation3 + $0xf4] sm:$0xf] %vm491_vm4, %v1374_v5  ;;  %v2875_v10 = vrot.slane %v1405_v48, 9  ;;  %3253 = vmatpush3.bf16.msra.mxu1 %v3425_v58 }
 0x176   : > { %v1227_v9 = vsel %vm3730_vm9, %v2874_v1, %v1226_v2  ;;  %v1439_v11 = vrot.slane %v1406_v49, 5  ;;  %v2876_v12 = vrot.slane %v1407_v59, 9  ;;  %2536 = vmatmul.mubr.bf16.gmra.mrb[32].mxu0 %v2908_v3  ;;  %v1443_v16 = vrot.slane %v1408_v8, 5  ;;  %v1413_v17 = vld [vmem:[#allocation2 + $0x30] sm:$0xe]  ;;  %v1512_v18 = vld [vmem:[#allocation3 + $0xc4] sm:$0xff] }
 0x177   : > { %v1133_v14 = vsel %vm3779_vm12, %v1128_v6, %v1132_v51  ;;  %v1142_v15 = vrot.slane %v1141_v7, 4  ;;  %1243 = vst.msk [vmem:[#allocation3 + $0x110] sm:$0xf] %vm491_vm4, %v1227_v9  ;;  %v3417_v19 = vld [vmem:[#allocation3 + $0xa4] ss:$36 sps:$4 sm:$0xff]   ;;  %v2879_v22 = vrot.slane %v1413_v17, 9  ;;  %v2906_v23 = vcombine.low %v1507_v13, %v1512_v18 }
 0x178   : > { %1162 = vst.msk [vmem:[#allocation3 + $0xe8] sm:$0xf] %vm491_vm4, %v1133_v14  ;;  %v1440_v20 = vsel %vm3730_vm9, %v2875_v10, %v1439_v11  ;;  %v1414_v21 = vld [vmem:[#allocation2 + $0x34] sm:$0x1]  ;;  %v1444_v26 = vsel %vm3730_vm9, %v2876_v12, %v1443_v16  ;;  %v1416_v28 = vld [vmem:[#allocation2 + $0x3c] sm:$0x1]  ;;  %2470 = vmatprep.mubr.bf16.mxu1 %v3417_v19 }
 0x179   : > { %v1147_v24 = vsel %vm3779_vm12, %v1142_v15, %v1146_v63  ;;  %v3426_v25 = vld [vmem:[%s4264_s2 + $0x230] sm:$0xff]   ;;  %1477 = vst.msk [vmem:[#allocation3 + $0x20] sm:$0xf] %vm491_vm4, %v1440_v20  ;;  %v1455_v30 = vrot.slane %v1414_v21, 5  ;;  %1478 = vst.msk [vmem:[#allocation3 + $0x44] sm:$0xf] %vm491_vm4, %v1444_v26  ;;  %2471 = vmatmul.mubr.bf16.gmra.mrb[24].mxu1 %v2906_v23 }
 0x17a   : > { %1163 = vst.msk [vmem:[#allocation3 + $0x10c] sm:$0xf] %vm491_vm4, %v1147_v24  ;;  %v2880_v31 = vrot.slane %v1415_v27, 9  ;;  %v1459_v4 = vrot.slane %v1416_v28, 5  ;;  %v1417_v32 = vld [vmem:[#allocation2 + $0x40] sm:$0xe]  ;;  %3254 = vmatprep.subr.bf16.mxu1 %v3426_v25 }
 0x17b   : > { %v1418_v33 = vld [vmem:[#allocation2 + $0x44] sm:$0x1]  ;;  %v1456_v35 = vsel %vm3730_vm9, %v2879_v22, %v1455_v30  ;;  %v2881_v36 = vrot.slane %v1417_v32, 9  ;;  %v3429_v41 = vld [vmem:[%s4264_s2 + $0x238] sm:$0xff]   ;;  %3255 = vmatpush3.bf16.msra.mxu1 %v3426_v25  ;;  %v2629_v49 = vld [vmem:[%s4265_s3] sm:$0x3] }
 0x17c   : > { %v1523_v34 = vld [vmem:[#allocation3 + $0x114] sm:$0xff]  ;;  %v1463_v37 = vrot.slane %v1418_v33, 5  ;;  %v1460_v38 = vsel %vm3730_vm9, %v2880_v31, %v1459_v4  ;;  %1481 = vst.msk [vmem:[#allocation3 + $0xb0] sm:$0xf] %vm491_vm4, %v1456_v35  ;;  %3256 = vmatprep.subr.bf16.mxu1 %v3429_v41  ;;  %v3430_v47 = vld [vmem:[#allocation3 + $0x68] ss:$36 sps:$4 sm:$0xff]   ;;  %3276 = vmatprep.subr.msk.bf16.mxu0 %vm2650_vm14, %v2629_v49 }
 0x17d   : > { %v1518_v39 = vld [vmem:[#allocation3 + $0xf0] sm:$0xff]  ;;  %1482 = vst.msk [vmem:[#allocation3 + $0xd4] sm:$0xf] %vm491_vm4, %v1460_v38  ;;  %v2652_v50 = vsel %vm2650_vm14, %v2629_v49, 0 }
 0x17e   : > { %v3419_v40 = vld [vmem:[#allocation3 + $0xf4] ss:$36 sps:$4 sm:$0xff]   ;;  %v1464_v43 = vsel %vm3730_vm9, %v2881_v36, %v1463_v37  ;;  %v2917_v45 = vcombine.low %v1518_v39, %v1523_v34  ;;  %v3423_v61 = vld [vmem:[#allocation3 + $0xec] ss:$36 sps:$4 sm:$0xff]   ;;  %3267 = vmatpush3.bf16.msra.mxu0 %v2652_v50 }
 0x17f   : > { %1483 = vst.msk [vmem:[#allocation3 + $0xf8] sm:$0xf] %vm491_vm4, %v1464_v43  ;;  %2543 = vmatprep.mubr.bf16.mxu0 %v3419_v40  ;;  %2478 = vmatprep.mubr.bf16.mxu1 %v3423_v61  ;;  %v2883_v0 = vld [vmem:[%s4270_s8] ss:$0 sm:$0xff] }
 0x180   : > { %2544 = vmatmul.mubr.bf16.gmra.mrb[36].mxu0 %v2917_v45  ;;  %v3428_v46 = vld [vmem:[#allocation3 + $0x20] ss:$36 sps:$4 sm:$0xff]   ;;  %3257 = vmatpush3.bf16.msra.mxu1 %v3429_v41 }
 0x181   : > { %v3427_v44 = vld [vmem:[#allocation3 + $0xe8] ss:$36 sps:$4 sm:$0xff]  }
 0x182   : > { %2479 = vmatmul.mubr.bf16.gmra.mrb[28].mxu1 %v3427_v44 }
 0x183   : > { %3258 = vmatprep.mubr.bf16.mxu1 %v3428_v46 }
 0x184   : > { %v3431_v48 = vld [vmem:[#allocation3 + $0xb0] ss:$36 sps:$4 sm:$0xff]  }
 0x186   : > { %v3432_v42 = vld [vmem:[#allocation3 + $0xf8] ss:$36 sps:$4 sm:$0xff]  }
 0x18a   : > { %3259 = vmatmul.mubr.bf16.vlgmr.msra.gmra.mrb[32].mxu1 %v3430_v47 }
 0x18b   : > { %3262 = vmatprep.mubr.bf16.mxu1 %v3431_v48 }
 0x192   : > { %3263 = vmatmul.mubr.bf16.gmra.mrb[36].mxu1 %v3432_v42 }
 0x1f6   : > { %v3111_v51 = vpop.f32.mrb[8].mxu0 }
 0x1f7   : > { %v3112_v52 = vpop.f32.mrb[9].mxu0 }
 0x1f8   : > { %v3113_v53 = vadd.f32 %v3112_v52, %v3111_v51  ;;  %v3114_v29 = vpop.f32.mrb[10].mxu0 }
 0x1f9   : > { %v3115_v54 = vpop.f32.mrb[11].mxu0 }
 0x1fa   : > { %v3116_v55 = vadd.f32 %v3115_v54, %v3114_v29 }
 0x1fe   : > { %v3117_v56 = vpop.f32.mrb[12].mxu0 }
 0x1ff   : > { %v3118_v57 = vpop.f32.mrb[13].mxu0 }
 0x200   : > { %v3119_v58 = vadd.f32 %v3118_v57, %v3117_v56  ;;  %v3120_v59 = vpop.f32.mrb[14].mxu0 }
 0x201   : > { %v3121_v60 = vpop.f32.mrb[15].mxu0 }
 0x202   : > { %v3122_v62 = vadd.f32 %v3121_v60, %v3120_v59 }
 0x207   : > { %v3071_v63 = vpop.f32.mrb[0].mxu1 }
 0x208   : > { %v3072_v1 = vpop.f32.mrb[1].mxu1 }
 0x209   : > { %v3073_v2 = vadd.f32 %v3072_v1, %v3071_v63  ;;  %v3074_v3 = vpop.f32.mrb[2].mxu1 }
 0x20a   : > { %v3075_v5 = vpop.f32.mrb[3].mxu1 }
 0x20b   : > { %v2327_v6 = vadd.f32 %v3073_v2, %v2883_v0  ;;  %v3076_v7 = vadd.f32 %v3075_v5, %v3074_v3 }
 0x20d   : > { %v2330_v10 = vadd.f32 %v3076_v7, %v2883_v0  ;;  %v2392_v13 = vadd.f32 %v3113_v53, %v2327_v6 }
 0x20e   : > { %v3123_v8 = vpop.f32.mrb[16].mxu0 }
 0x20f   : > { %v3124_v9 = vpop.f32.mrb[17].mxu0  ;;  %v2395_v17 = vadd.f32 %v3116_v55, %v2330_v10 }
 0x210   : > { %v3125_v11 = vadd.f32 %v3124_v9, %v3123_v8  ;;  %v3126_v12 = vpop.f32.mrb[18].mxu0  ;;  %v3077_v15 = vpop.f32.mrb[4].mxu1 }
 0x211   : > { %v3127_v14 = vpop.f32.mrb[19].mxu0  ;;  %v3078_v18 = vpop.f32.mrb[5].mxu1 }
 0x212   : > { %v3128_v16 = vadd.f32 %v3127_v14, %v3126_v12  ;;  %v3079_v19 = vadd.f32 %v3078_v18, %v3077_v15  ;;  %v3080_v20 = vpop.f32.mrb[6].mxu1 }
 0x213   : > { %v3081_v21 = vpop.f32.mrb[7].mxu1 }
 0x214   : > { %v2335_v22 = vadd.f32 %v3079_v19, %v2883_v0  ;;  %v3082_v23 = vadd.f32 %v3081_v21, %v3080_v20 }
 0x216   : > { %v2338_v26 = vadd.f32 %v3082_v23, %v2883_v0  ;;  %v2400_v30 = vadd.f32 %v3119_v58, %v2335_v22 }
 0x218   : > { %v2403_v33 = vadd.f32 %v3122_v62, %v2338_v26 }
 0x21a   : > { %v3129_v24 = vpop.f32.mrb[20].mxu0  ;;  %v3083_v4 = vpop.f32.mrb[8].mxu1 }
 0x21b   : > { %v3130_v25 = vpop.f32.mrb[21].mxu0  ;;  %v3084_v34 = vpop.f32.mrb[9].mxu1 }
 0x21c   : > { %v3131_v27 = vadd.f32 %v3130_v25, %v3129_v24  ;;  %v3132_v28 = vpop.f32.mrb[22].mxu0  ;;  %v3085_v35 = vadd.f32 %v3084_v34, %v3083_v4  ;;  %v3086_v36 = vpop.f32.mrb[10].mxu1 }
 0x21d   : > { %v3133_v31 = vpop.f32.mrb[23].mxu0  ;;  %v3087_v37 = vpop.f32.mrb[11].mxu1 }
 0x21e   : > { %v3134_v32 = vadd.f32 %v3133_v31, %v3132_v28  ;;  %v2343_v38 = vadd.f32 %v3085_v35, %v2883_v0  ;;  %v3088_v39 = vadd.f32 %v3087_v37, %v3086_v36 }
 0x220   : > { %v2346_v40 = vadd.f32 %v3088_v39, %v2883_v0  ;;  %v2408_v41 = vadd.f32 %v3125_v11, %v2343_v38 }
 0x222   : > { %v2411_v45 = vadd.f32 %v3128_v16, %v2346_v40 }
 0x228   : > { %v3089_v43 = vpop.f32.mrb[12].mxu1 }
 0x229   : > { %v3090_v61 = vpop.f32.mrb[13].mxu1 }
 0x22a   : > { %v3091_v46 = vadd.f32 %v3090_v61, %v3089_v43  ;;  %v3092_v47 = vpop.f32.mrb[14].mxu1 }
 0x22b   : > { %v3191_v44 = vpop.f32.mrb[24].mxu0  ;;  %v3093_v42 = vpop.f32.mrb[15].mxu1 }
 0x22c   : > { %v3192_v48 = vpop.f32.mrb[25].mxu0  ;;  %v2351_v51 = vadd.f32 %v3091_v46, %v2883_v0  ;;  %v3094_v52 = vadd.f32 %v3093_v42, %v3092_v47 }
 0x22d   : > { %v3193_v49 = vadd.f32 %v3192_v48, %v3191_v44  ;;  %v3194_v50 = vpop.f32.mrb[26].mxu0 }
 0x22e   : > { %v3195_v53 = vpop.f32.mrb[27].mxu0  ;;  %v2354_v54 = vadd.f32 %v3094_v52, %v2883_v0  ;;  %v2416_v55 = vadd.f32 %v3131_v27, %v2351_v51 }
 0x22f   : > { %v3196_v29 = vadd.f32 %v3195_v53, %v3194_v50 }
 0x230   : > { %v2419_v57 = vadd.f32 %v3134_v32, %v2354_v54 }
 0x232   : > { %v3151_v56 = vpop.f32.mrb[16].mxu1 }
 0x233   : > { %v3152_v58 = vpop.f32.mrb[17].mxu1 }
 0x234   : > { %v3153_v59 = vadd.f32 %v3152_v58, %v3151_v56  ;;  %v3154_v60 = vpop.f32.mrb[18].mxu1 }
 0x235   : > { %v3155_v62 = vpop.f32.mrb[19].mxu1 }
 0x236   : > { %v2457_v63 = vadd.f32 %v3153_v59, %v2392_v13  ;;  %v3156_v1 = vadd.f32 %v3155_v62, %v3154_v60 }
 0x238   : > { %v2460_v3 = vadd.f32 %v3156_v1, %v2395_v17  ;;  %v2522_v6 = vadd.f32 %v3193_v49, %v2457_v63 }
 0x23a   : > { %v3197_v2 = vpop.f32.mrb[28].mxu0  ;;  %v2525_v10 = vadd.f32 %v3196_v29, %v2460_v3 }
 0x23b   : > { %v3198_v5 = vpop.f32.mrb[29].mxu0 }
 0x23c   : > { %v3199_v7 = vadd.f32 %v3198_v5, %v3197_v2  ;;  %v3200_v8 = vpop.f32.mrb[30].mxu0 }
 0x23d   : > { %v3201_v9 = vpop.f32.mrb[31].mxu0 }
 0x23e   : > { %v3202_v11 = vadd.f32 %v3201_v9, %v3200_v8 }
 0x242   : > { %v3157_v12 = vpop.f32.mrb[20].mxu1 }
 0x243   : > { %v3158_v0 = vpop.f32.mrb[21].mxu1 }
 0x244   : > { %v3159_v14 = vadd.f32 %v3158_v0, %v3157_v12  ;;  %v3160_v15 = vpop.f32.mrb[22].mxu1 }
 0x245   : > { %v3161_v16 = vpop.f32.mrb[23].mxu1 }
 0x246   : > { %v2465_v18 = vadd.f32 %v3159_v14, %v2400_v30  ;;  %v3162_v19 = vadd.f32 %v3161_v16, %v3160_v15 }
 0x248   : > { %v2468_v21 = vadd.f32 %v3162_v19, %v2403_v33  ;;  %v2530_v13 = vadd.f32 %v3199_v7, %v2465_v18  ;;  %v3047_v19 = vld [vmem:[%s3610_s29 + $0x8] sm:$0xff]  }
 0x249   : > { %v3203_v20 = vpop.f32.mrb[32].mxu0 }
 0x24a   : > { %v3204_v22 = vpop.f32.mrb[33].mxu0  ;;  %v2533_v24 = vadd.f32 %v3202_v11, %v2468_v21  ;;  %v2992_v21 = vld [vmem:[%s4266_s4] ss:$0 sm:$0xff] }
 0x24b   : > { %v3205_v23 = vadd.f32 %v3204_v22, %v3203_v20  ;;  %v3206_v17 = vpop.f32.mrb[34].mxu0  ;;  %v3029_v20 = vld [vmem:[%s3610_s29] sm:$0xff]  }
 0x24c   : > { %v3207_v25 = vpop.f32.mrb[35].mxu0  ;;  %v3163_v27 = vpop.f32.mrb[24].mxu1 }
 0x24d   : > { %v3208_v26 = vadd.f32 %v3207_v25, %v3206_v17  ;;  %v3164_v28 = vpop.f32.mrb[25].mxu1  ;;  %v3035_v25 = vunpack.c.h.bf16 %v3047_v19 }
 0x24e   : > { %v3165_v31 = vadd.f32 %v3164_v28, %v3163_v27  ;;  %v3166_v4 = vpop.f32.mrb[26].mxu1  ;;  %v3031_v28 = vunpack.c.h.bf16 %v3029_v20 }
 0x24f   : > { %v3167_v32 = vpop.f32.mrb[27].mxu1 }
 0x250   : > { %v2473_v34 = vadd.f32 %v3165_v31, %v2408_v41  ;;  %v3168_v35 = vadd.f32 %v3167_v32, %v3166_v4 }
 0x252   : > { %v2476_v37 = vadd.f32 %v3168_v35, %v2411_v45  ;;  %v2538_v38 = vadd.f32 %v3205_v23, %v2473_v34  ;;  %v3030_v23 = vunpack.c.l.bf16 %v3029_v20 }
 0x253   : > { %v3209_v36 = vpop.f32.mrb[36].mxu0 }
 0x254   : > { %v3210_v30 = vpop.f32.mrb[37].mxu0  ;;  %v2541_v43 = vadd.f32 %v3208_v26, %v2476_v37 }
 0x255   : > { %v3211_v39 = vadd.f32 %v3210_v30, %v3209_v36  ;;  %v3212_v33 = vpop.f32.mrb[38].mxu0  ;;  %v3169_v44 = vpop.f32.mrb[28].mxu1  ;;  %v3049_v36 = vld [vmem:[%s3610_s29 + $0x18] sm:$0xff]  }
 0x256   : > { %v3213_v40 = vpop.f32.mrb[39].mxu0  ;;  %v3170_v46 = vpop.f32.mrb[29].mxu1 }
 0x257   : > { %v3214_v61 = vadd.f32 %v3213_v40, %v3212_v33  ;;  %v3171_v47 = vadd.f32 %v3170_v46, %v3169_v44  ;;  %v3172_v48 = vpop.f32.mrb[30].mxu1 }
 0x258   : > { %v3173_v42 = vpop.f32.mrb[31].mxu1 }
 0x259   : > { %v2481_v49 = vadd.f32 %v3171_v47, %v2416_v55  ;;  %v3174_v50 = vadd.f32 %v3173_v42, %v3172_v48  ;;  %v3043_v42 = vunpack.c.h.bf16 %v3049_v36 }
 0x25b   : > { %v2484_v51 = vadd.f32 %v3174_v50, %v2419_v57  ;;  %v2546_v52 = vadd.f32 %v3211_v39, %v2481_v49 }
 0x25d   : > { %v3260_v41 = vpop.f32.mrb[32].mxu1  ;;  %v2549_v53 = vadd.f32 %v3214_v61, %v2484_v51 }
 0x25e   : > { %v2595_v29 = vadd.f32 %v3260_v41, %v2530_v13  ;;  %v2586_v45 = vpop.f32.mrb[33].mxu1  ;;  %v3034_v13 = vunpack.c.l.bf16 %v3047_v19 }
 0x25f   : > { %v2587_v54 = vadd.f32 %v2586_v45, %v2522_v6  ;;  %v3261_v56 = vpop.f32.mrb[34].mxu1 }
 0x260   : > { %v2598_v58 = vadd.f32 %v3261_v56, %v2533_v24  ;;  %v2589_v59 = vpop.f32.mrb[35].mxu1  ;;  %v2619_v62 = vmax.f32 %v2595_v29, 0.0 }
 0x261   : > { %v2590_v60 = vadd.f32 %v2589_v59, %v2525_v10  ;;  %v2617_v1 = vmax.f32 %v2587_v54, 0.0 }
 0x262   : > { %v2620_v63 = vmax.f32 %v2598_v58, 0.0 }
 0x263   : > { %v2618_v2 = vmax.f32 %v2590_v60, 0.0 }
 0x264   : > { %v2626_v3 = vpack.c.bf16 %v2620_v63, %v2619_v62 }
 0x265   : > { %v2625_v5 = vpack.c.bf16 %v2618_v2, %v2617_v1  ;;  %v3264_v55 = vpop.f32.mrb[36].mxu1 }
 0x266   : > { %v2611_v7 = vadd.f32 %v3264_v55, %v2546_v52  ;;  %v2602_v57 = vpop.f32.mrb[37].mxu1 }
 0x267   : > { %v2603_v8 = vadd.f32 %v2602_v57, %v2538_v38  ;;  %v3265_v9 = vpop.f32.mrb[38].mxu1  ;;  %3268 = vmatprep.mubr.msk.bf16.mxu0 %vm2637_vm15, %v2625_v5  ;;  %v3048_v38 = vld [vmem:[%s3610_s29 + $0x10] sm:$0xff]   ;;  %s3011_s29 = sshll.u32 %s3572_s13, 9  ;;  %s4221_s13 = scalar_lea.sflag [#allocation5], %s323_s27 }
 0x268   : > { %v2614_v6 = vadd.f32 %v3265_v9, %v2549_v53  ;;  %v2605_v11 = vpop.f32.mrb[39].mxu1  ;;  %3269 = vmatmul.mubr.msk.bf16.vlgmr.msra.gmra.mrb[40].mxu0 %vm2637_vm15, %v2626_v3  ;;  %v2623_v12 = vmax.f32 %v2611_v7, 0.0  ;;  %v3038_v46 = vunpack.c.l.bf16 %v3048_v38  ;;  %v3039_v51 = vunpack.c.h.bf16 %v3048_v38  ;;  %s4209_s24 = scalar_lea.hbm %s4271_s9, %s3011_s29 }
 0x269   : > { %v2606_v10 = vadd.f32 %v2605_v11, %v2541_v43  ;;  %v2621_v14 = vmax.f32 %v2603_v8, 0.0  ;;  %v3042_v43 = vunpack.c.l.bf16 %v3049_v36 }
 0x26a   : > { %v2624_v0 = vmax.f32 %v2614_v6, 0.0 }
 0x26b   : > { %v2622_v15 = vmax.f32 %v2606_v10, 0.0 }
 0x26c   : > { %v2628_v16 = vpack.c.bf16 %v2624_v0, %v2623_v12 }
 0x26d   : > { %v2627_v18 = vpack.c.bf16 %v2622_v15, %v2621_v14 }
 0x26f   : > { %3272 = vmatprep.mubr.msk.bf16.mxu0 %vm2637_vm15, %v2627_v18 }
 0x270   : > { %3273 = vmatmul.mubr.msk.bf16.gmra.mrb[44].mxu0 %vm2637_vm15, %v2628_v16 }
 0x33b   : > { %v3270_v22 = vpop.f32.mrb[40].mxu0 }
 0x33c   : > { %v2697_v17 = vadd.f32 %v3270_v22, %v2992_v21  ;;  %v2688_v24 = vpop.f32.mrb[41].mxu0 }
 0x33d   : > { %v2689_v26 = vadd.f32 %v2992_v21, %v2688_v24  ;;  %v3271_v27 = vpop.f32.mrb[42].mxu0 }
 0x33e   : > { %v2737_v31 = vadd.f32 %v3034_v13, %v2697_v17  ;;  %v2700_v4 = vadd.f32 %v3271_v27, %v2992_v21  ;;  %v2691_v32 = vpop.f32.mrb[43].mxu0 }
 0x33f   : > { %v2735_v34 = vadd.f32 %v3030_v23, %v2689_v26  ;;  %v2692_v35 = vadd.f32 %v2992_v21, %v2691_v32 }
 0x340   : > { %v2745_v37 = vpack.c.bf16 %v2737_v31, %v2737_v31  ;;  %v2738_v30 = vadd.f32 %v3035_v25, %v2700_v4 }
 0x341   : > { %v2743_v39 = vpack.c.bf16 %v2735_v34, %v2735_v34  ;;  %v2736_v33 = vadd.f32 %v3031_v28, %v2692_v35 }
 0x342   : > { %2754 = vst.msk [vmem:[%s4192_s17 + $0x8] sm:$0xf] %vm2751_vm0, %v2745_v37  ;;  %v2746_v40 = vpack.c.bf16 %v2738_v30, %v2738_v30 }
 0x343   : > { %2752 = vst.msk [vmem:[%s4192_s17] sm:$0xf] %vm2751_vm0, %v2743_v39  ;;  %v2744_v61 = vpack.c.bf16 %v2736_v33, %v2736_v33  ;;  %v3274_v44 = vpop.f32.mrb[44].mxu0 }
 0x344   : > { %2755 = vst.msk [vmem:[%s4192_s17 + $0xc] sm:$0xf] %vm2751_vm0, %v2746_v40  ;;  %v2713_v47 = vadd.f32 %v3274_v44, %v2992_v21  ;;  %v2704_v48 = vpop.f32.mrb[45].mxu0 }
 0x345   : > { %2753 = vst.msk [vmem:[%s4192_s17 + $0x4] sm:$0xf] %vm2751_vm0, %v2744_v61  ;;  %v2705_v49 = vadd.f32 %v2992_v21, %v2704_v48  ;;  %v3275_v50 = vpop.f32.mrb[46].mxu0 }
 0x346   : > { %v2741_v52 = vadd.f32 %v3042_v43, %v2713_v47  ;;  %v2716_v41 = vadd.f32 %v3275_v50, %v2992_v21  ;;  %v2707_v53 = vpop.f32.mrb[47].mxu0 }
 0x347   : > { %v2739_v29 = vadd.f32 %v3038_v46, %v2705_v49  ;;  %v2708_v45 = vadd.f32 %v2992_v21, %v2707_v53 }
 0x348   : > { %v2749_v54 = vpack.c.bf16 %v2741_v52, %v2741_v52  ;;  %v2742_v56 = vadd.f32 %v3043_v42, %v2716_v41 }
 0x349   : > { %v2747_v58 = vpack.c.bf16 %v2739_v29, %v2739_v29  ;;  %v2740_v59 = vadd.f32 %v3039_v51, %v2708_v45 }
 0x34a   : > { %2758 = vst.msk [vmem:[%s4192_s17 + $0x18] sm:$0xf] %vm2751_vm0, %v2749_v54  ;;  %v2750_v60 = vpack.c.bf16 %v2742_v56, %v2742_v56 }
 0x34b   : > { %2756 = vst.msk [vmem:[%s4192_s17 + $0x10] sm:$0xf] %vm2751_vm0, %v2747_v58  ;;  %v2748_v62 = vpack.c.bf16 %v2740_v59, %v2740_v59 }
 0x34c   : > { %2759 = vst.msk [vmem:[%s4192_s17 + $0x1c] sm:$0xf] %vm2751_vm0, %v2750_v60 }
 0x34d   : > { %2757 = vst.msk [vmem:[%s4192_s17 + $0x14] sm:$0xf] %vm2751_vm0, %v2748_v62 }
 0x34e   : > { %3446 = shalt.err (!%p3443_p3)
}
 0x34f   : > { %s3447_s27 = scalar_lea.hbm %s4209_s24, 512  ;;  %s3451_s29 = scalar_lea.hbm %s4271_s9, 4096 }
 0x350   : > { %p3448_p4 = scmp.ne.s32.totalorder %s4209_s24, %s3447_s27  ;;  %p3452_p9 = scmp.lt.u32.totalorder %s4209_s24, %s4271_s9 }
 0x351   : > { %p3453_p10 = scmp.lt.u32.totalorder %s3451_s29, %s3447_s27  ;;  %p3455_p12 = scmp.lt.u32.totalorder %s3447_s27, %s4209_s24 }
 0x352   : > { %p3449_p7 = pnand %p3448_p4, %p3589_p5 }
 0x353   : > { %p3454_p11 = por %p3453_p10, %p3452_p9 }
 0x354   : > { %p3450_p8 = pneg %p3449_p7 }
 0x355   : > { %p3456_p13 = por %p3455_p12, %p3454_p11 }
 0x357   : > { %p3457_p0 = pnand %p3456_p13, %p3450_p8 }
 0x359   : > { %3460 = shalt.err (!%p3457_p0)
}
 0x35a   : > { %s3499_s25 = smov 64   ;;  %s3500_s26 = smov 4  }
 0x35b   : > { %3277 = dma.vmem_to_hbm [thread:$0]  (%p3589_p5), %s4211_s21, 512, %s4209_s24, %s4221_s13, %s3499_s25, %s3499_s25, %s3500_s26  }
 0x35c PF: > { %p3283_p1 = scmp.ge.s32.totalorder %s3495_s12, 2  ;;  %s2789_s28 = sand.u32 1, %s3483_s30  }
 0x35d   : > { %s2790_s14 = scalar_lea.sflag [#allocation5], %s2789_s28 }
 0x35e   : > { %p3280_p2 = pnand %p3283_p1, %p3593_p6 }
 0x360   : > { %3478 = dma.done.wait (!%p3280_p2), %s2790_s14, 512  }
 0x361   : > { %3480 = vsyncadd (!%p3280_p2), %s2790_s14, 4294966784  ;;  %p19_p3 = scmp.ge.s32.totalorder %s3576_s15, 10   ;;  %s4284_s30 = smov %s3487_s10 }
 0x362   : > { %s4285_s10 = smov %s3491_s11  ;;  %s4286_s11 = smov %s3587_s18 }
 0x363   : > { %s4287_s12 = smov %s3576_s15  ;;  %21 = sbr.rel (!%p19_p3) target bundleno = 3 (0x3), region = 94 }
 0x36a   :  { %2795 = vsyncpa [#allocation5], 1 }
 0x36b   :  { %2797 = vsyncpa [#allocation5 + $0x1], 1 }

</bundles_post_ra>
